<compile_context>
chip_gen: v6e
topology: v6e:2x2x1
jax: 0.10.0
libtpu: 0.0.40
codegen_flags: <defaults>
</compile_context>

<pallas_src>
import math

import jax
import jax.numpy as jnp
from jax.experimental import pallas as pl
from jax.experimental.pallas import tpu as pltpu

# ----------------------------- configuration -------------------------------
N_HEAD = 2
D_K = 16
D_V = 16
NEWS_DIM = N_HEAD * D_V      # 32  (news_dim must equal n_head*d_v for pooling)
QUERY_DIM = 16
BATCH = 2
SEQ = 8


def _round8(n):
    return ((n + 7) // 8) * 8


# ------------------------------ Pallas kernel -------------------------------
def _make_kernel(L, D, n_head, d_k, q_dim):
    flat = L * D                 # 256: flattened per-row feature width
    n_grp = L * n_head           # 16:  (query l, head h) groups

    def rot(x, s):
        """Left-rotate the lane dim: out[:, p] = x[:, (p + s) % n] (static s)."""
        if s == 0:
            return x
        return jnp.concatenate([x[:, s:], x[:, :s]], axis=-1)

    def kernel(h_ref, wbig_ref, red_ref, exp_ref, w1b_ref, b1_ref, w2_ref,
               sum_ref, bc_ref, b2_ref, out_ref):
        f32 = jnp.float32

        # (1) fused q/k/v projection for all L positions of each row in ONE
        #     bf16 MXU matmul (contraction 256); output lanes are already in
        #     the flattened layout  q | k | v,  lane = 32*l + 16*h + d.
        qkv = jnp.dot(h_ref[...].astype(jnp.bfloat16), wbig_ref[...],
                      preferred_element_type=f32)            # (tb, 3*flat)
        qf = qkv[:, :flat]
        kf = qkv[:, flat:2 * flat]
        vf = qkv[:, 2 * flat:]

        # (2) scores, lane-dense: (tb, 128), lane = 16*t + 2*l + h where the
        #     key is m = (l + t) % L.  Per t: one full-lane VPU multiply plus
        #     one shared d-reduce matmul (0/1 matrix, 1/sqrt(d_k) folded in).
        cols = []
        for t in range(L):
            prod = qf * rot(kf, D * t)                       # (tb, 256) VPU
            cols.append(jnp.dot(prod, red_ref[...],
                                preferred_element_type=f32))  # (tb, 16)
        scores = jnp.concatenate(cols, axis=-1)               # (tb, 128)

        # (3) softmax over keys — exact (reference: exp / (sum_keys + 1e-8)).
        #     The key offset t sits at lane-stride 16, so a log2(L)-deep
        #     rotate+add tree yields every lane's denominator, pre-broadcast.
        ee = jnp.exp(scores)                                   # full-lane EUP
        den = ee
        s = n_grp
        while s < L * n_grp:
            den = den + rot(den, s)
            s *= 2
        attn = ee / (den + 1e-8)                               # exact division

        # (4) context in the flattened layout (lane = 32*l + 16*h + d):
        #     expand each 16-lane attention slice to 256 lanes with a constant
        #     0/1 matmul and multiply-accumulate against the rotated V.
        ctx = jnp.dot(attn[:, :n_grp], exp_ref[...],
                      preferred_element_type=f32) * vf
        for t in range(1, L):
            a_t = jnp.dot(attn[:, t * n_grp:(t + 1) * n_grp], exp_ref[...],
                          preferred_element_type=f32)          # (tb, 256)
            ctx = ctx + a_t * rot(vf, D * t)

        # (5) additive attention pooling over the sequence.
        hid = jnp.tanh(jnp.dot(ctx.astype(jnp.bfloat16), w1b_ref[...],
                               preferred_element_type=f32) + b1_ref[...])
        logits = jnp.dot(hid * w2_ref[...], sum_ref[...],
                         preferred_element_type=f32) + b2_ref[...]   # (tb, L)
        au = jnp.exp(logits)
        alpha = au / (jnp.sum(au, axis=-1, keepdims=True) + 1e-8)     # exact

        # weighted sum over l: expand alpha over each 32-lane block, multiply,
        # then a stride-32 rotate+add tree reduces over l; lanes [0, 32) hold u.
        w = jnp.dot(alpha, bc_ref[...], preferred_element_type=f32) * ctx
        s = D
        while s < L * D:
            w = w + rot(w, s)
            s *= 2
        out_ref[...] = w[:, :D]                                # (tb, 32)

    return kernel


# ------------------------------ wrapper (glue) -------------------------------
def attn_user_encoder(h, params, *, tile_b=512):
    """h: (B, L, NEWS_DIM) f32 -> (B, NEWS_DIM) f32."""
    B, L, D = h.shape
    assert L & (L - 1) == 0, "sequence length must be a power of two"
    assert D == N_HEAD * D_V
    wq, wk, wv, w1, b1, w2, b2 = params
    flat = L * D
    n_grp = L * N_HEAD

    eyeL = jnp.eye(L, dtype=jnp.float32)
    eyeG = jnp.eye(n_grp, dtype=jnp.float32)

    # Host-side plumbing constants (tiny, built once per call / jit trace).
    w_big = jnp.concatenate(
        [jnp.kron(eyeL, wq), jnp.kron(eyeL, wk), jnp.kron(eyeL, wv)],
        axis=1).astype(jnp.bfloat16)                           # (256, 768)
    red = (jnp.kron(eyeG, jnp.ones((D_K, 1), jnp.float32))
           * (1.0 / math.sqrt(D_K)))                           # (256, 16)
    expd = jnp.kron(eyeG, jnp.ones((1, D_V), jnp.float32))     # (16, 256)
    w1_big = jnp.kron(eyeL, w1).astype(jnp.bfloat16)           # (256, 128)
    b1_t = jnp.tile(b1.reshape(1, QUERY_DIM), (1, L)).astype(jnp.float32)
    w2_t = jnp.tile(w2.reshape(1, QUERY_DIM), (1, L)).astype(jnp.float32)
    summ = jnp.kron(eyeL, jnp.ones((QUERY_DIM, 1), jnp.float32))  # (128, 8)
    bcast = jnp.kron(eyeL, jnp.ones((1, D), jnp.float32))         # (8, 256)
    b2_2d = b2.reshape(1, 1).astype(jnp.float32)

    # Free layout change: one row per batch element, fully lane-flattened.
    hf = h.reshape(B, flat)

    # Batch tile: multiple of 8 (f32 sublane tile); cap at ceil(B/2) so the
    # "parallel" grid axis has >=2 steps whenever B allows it (v7x: 2 TCs).
    tb = max(8, min(_round8(tile_b), _round8(pl.cdiv(B, 2))))
    bp = pl.cdiv(B, tb) * tb
    if bp != B:
        hf = jnp.pad(hf, ((0, bp - B), (0, 0)))

    def const_spec(a):
        z = (0,) * a.ndim
        return pl.BlockSpec(a.shape, lambda i, z=z: z)

    consts = (w_big, red, expd, w1_big, b1_t, w2_t, summ, bcast, b2_2d)

    mm_flops = 2 * (flat * 3 * flat          # projection
                    + L * flat * n_grp       # score reduce
                    + L * n_grp * flat       # attention expand
                    + flat * L * QUERY_DIM   # pooling FC
                    + L * QUERY_DIM * L      # logits reduce
                    + L * flat)              # alpha expand
    cost = pl.CostEstimate(
        flops=int(bp * mm_flops),
        transcendentals=int(bp * (L * n_grp + L + L * QUERY_DIM)),
        bytes_accessed=int(bp * (flat + D) * 4
                           + sum(int(c.size) * c.dtype.itemsize
                                 for c in consts)))

    out = pl.pallas_call(
        _make_kernel(L, D, N_HEAD, D_K, QUERY_DIM),
        out_shape=jax.ShapeDtypeStruct((bp, D), jnp.float32),
        grid=(bp // tb,),
        in_specs=[pl.BlockSpec((tb, flat), lambda i: (i, 0))]
                 + [const_spec(c) for c in consts],
        out_specs=pl.BlockSpec((tb, D), lambda i: (i, 0)),
        compiler_params=pltpu.CompilerParams(
            dimension_semantics=("parallel",),
            vmem_limit_bytes=32 * 1024 * 1024),   # explicit (v5e default 16MiB)
        cost_estimate=cost,
    )(hf, *consts)
    return out[:B]


# --------------------------- pure-JAX reference ------------------------------
def reference(h, params):
    wq, wk, wv, w1, b1, w2, b2 = params
    B, L, D = h.shape
    q = (h @ wq).reshape(B, L, N_HEAD, D_K).transpose(0, 2, 1, 3)
    k = (h @ wk).reshape(B, L, N_HEAD, D_K).transpose(0, 2, 1, 3)
    v = (h @ wv).reshape(B, L, N_HEAD, D_V).transpose(0, 2, 1, 3)
    scores = jnp.einsum("bhqd,bhkd->bhqk", q, k) / math.sqrt(D_K)
    e = jnp.exp(scores)
    attn = e / (jnp.sum(e, axis=-1, keepdims=True) + 1e-8)
    ctx = jnp.einsum("bhqk,bhkd->bhqd", attn, v)
    ctx = ctx.transpose(0, 2, 1, 3).reshape(B, L, N_HEAD * D_V)
    e1 = jnp.tanh(ctx @ w1 + b1)
    alpha = jnp.exp(e1 @ w2 + b2)
    alpha = alpha / (jnp.sum(alpha, axis=1, keepdims=True) + 1e-8)
    return jnp.sum(ctx * alpha, axis=1)


# --------------------------- deterministic params ----------------------------
def init_params(key):
    ks = jax.random.split(key, 7)

    def uniform(k, shape, fan_in):
        bound = 1.0 / math.sqrt(fan_in)
        return jax.random.uniform(k, shape, jnp.float32, -bound, bound)

    # Weights stored pre-transposed (in_dim, out_dim) so kernels do x @ W.
    wq = uniform(ks[0], (NEWS_DIM, N_HEAD * D_K), NEWS_DIM)
    wk = uniform(ks[1], (NEWS_DIM, N_HEAD * D_K), NEWS_DIM)
    wv = uniform(ks[2], (NEWS_DIM, N_HEAD * D_V), NEWS_DIM)
    w1 = uniform(ks[3], (NEWS_DIM, QUERY_DIM), NEWS_DIM)
    b1 = uniform(ks[4], (1, QUERY_DIM), NEWS_DIM)
    w2 = uniform(ks[5], (QUERY_DIM, 1), QUERY_DIM)
    b2 = uniform(ks[6], (1, 1), QUERY_DIM)
    return (wq, wk, wv, w1, b1, w2, b2)


if __name__ == "__main__":
    key = jax.random.PRNGKey(0)
    k_h, k_p = jax.random.split(key)
    h = jax.random.normal(k_h, (BATCH, SEQ, NEWS_DIM), dtype=jnp.float32)
    params = init_params(k_p)

    out = jax.block_until_ready(attn_user_encoder(h, params))
    ref = reference(h, params)

    assert out.shape == (BATCH, NEWS_DIM)
    # bf16 MXU operands for the projection / pooling FC (review item 3) give
    # ~1e-3-level deviation vs the f32 reference; softmax arithmetic is exact.
    assert jnp.allclose(out, ref, atol=1e-2, rtol=1e-2), "mismatch vs reference"
    print("KERNEL_OK")
</pallas_src>

<mosaic_0001>
module attributes {stable_mosaic.version = 11 : i64} {
  func.func @kernel(%arg0: i32, %arg1: memref<8x256xf32, #tpu.memory_space<vmem>>, %arg2: memref<256x768xbf16, #tpu.memory_space<vmem>>, %arg3: memref<256x16xf32, #tpu.memory_space<vmem>>, %arg4: memref<16x256xf32, #tpu.memory_space<vmem>>, %arg5: memref<256x128xbf16, #tpu.memory_space<vmem>>, %arg6: memref<1x128xf32, #tpu.memory_space<vmem>>, %arg7: memref<1x128xf32, #tpu.memory_space<vmem>>, %arg8: memref<128x8xf32, #tpu.memory_space<vmem>>, %arg9: memref<8x256xf32, #tpu.memory_space<vmem>>, %arg10: memref<1x1xf32, #tpu.memory_space<vmem>>, %arg11: memref<8x32xf32, #tpu.memory_space<vmem>>) attributes {dimension_semantics = [#tpu.dimension_semantics<parallel>], iteration_bounds = array<i64: 1>, scalar_prefetch = 0 : i64, scratch_operands = 0 : i64, tpu.core_type = #tpu.core_type<tc>, window_params = [{transform_indices = @transform_0, window_bounds = array<i64: 8, 256>}, {pipeline_mode = #tpu.pipeline_mode<synchronous>, transform_indices = @transform_1, window_bounds = array<i64: 256, 768>}, {pipeline_mode = #tpu.pipeline_mode<synchronous>, transform_indices = @transform_2, window_bounds = array<i64: 256, 16>}, {pipeline_mode = #tpu.pipeline_mode<synchronous>, transform_indices = @transform_3, window_bounds = array<i64: 16, 256>}, {pipeline_mode = #tpu.pipeline_mode<synchronous>, transform_indices = @transform_4, window_bounds = array<i64: 256, 128>}, {pipeline_mode = #tpu.pipeline_mode<synchronous>, transform_indices = @transform_5, window_bounds = array<i64: 1, 128>}, {pipeline_mode = #tpu.pipeline_mode<synchronous>, transform_indices = @transform_6, window_bounds = array<i64: 1, 128>}, {pipeline_mode = #tpu.pipeline_mode<synchronous>, transform_indices = @transform_7, window_bounds = array<i64: 128, 8>}, {pipeline_mode = #tpu.pipeline_mode<synchronous>, transform_indices = @transform_8, window_bounds = array<i64: 8, 256>}, {pipeline_mode = #tpu.pipeline_mode<synchronous>, transform_indices = @transform_9, window_bounds = array<i64: 1, 1>}, {transform_indices = @transform_10, window_bounds = array<i64: 8, 32>}]} {
    %c0 = arith.constant 0 : index
    %c0_0 = arith.constant 0 : index
    %0 = vector.load %arg1[%c0, %c0_0] : memref<8x256xf32, #tpu.memory_space<vmem>>, vector<8x256xf32>
    %1 = arith.truncf %0 : vector<8x256xf32> to vector<8x256xbf16>
    %c0_1 = arith.constant 0 : index
    %c0_2 = arith.constant 0 : index
    %2 = vector.load %arg2[%c0_1, %c0_2] : memref<256x768xbf16, #tpu.memory_space<vmem>>, vector<256x768xbf16>
    %cst = arith.constant dense<0.000000e+00> : vector<8x768xf32>
    %3 = tpu.matmul %1, %2, %cst {dimension_numbers = #tpu.dot_dimension_numbers<[1], [0], [0], [1], [0, 0, 1, 1], [], []>} : vector<8x256xbf16>, vector<256x768xbf16>, vector<8x768xf32> -> vector<8x768xf32>
    %4 = vector.extract_strided_slice %3 {offsets = [0, 0], sizes = [8, 256], strides = [1, 1]} : vector<8x768xf32> to vector<8x256xf32>
    %5 = vector.extract_strided_slice %3 {offsets = [0, 256], sizes = [8, 256], strides = [1, 1]} : vector<8x768xf32> to vector<8x256xf32>
    %6 = vector.extract_strided_slice %3 {offsets = [0, 512], sizes = [8, 256], strides = [1, 1]} : vector<8x768xf32> to vector<8x256xf32>
    %7 = arith.mulf %4, %5 : vector<8x256xf32>
    %c0_3 = arith.constant 0 : index
    %c0_4 = arith.constant 0 : index
    %8 = vector.load %arg3[%c0_3, %c0_4] : memref<256x16xf32, #tpu.memory_space<vmem>>, vector<256x16xf32>
    %cst_5 = arith.constant dense<0.000000e+00> : vector<8x16xf32>
    %9 = tpu.matmul %7, %8, %cst_5 {dimension_numbers = #tpu.dot_dimension_numbers<[1], [0], [0], [1], [0, 0, 1, 1], [], []>} : vector<8x256xf32>, vector<256x16xf32>, vector<8x16xf32> -> vector<8x16xf32>
    %10 = vector.extract_strided_slice %5 {offsets = [0, 32], sizes = [8, 224], strides = [1, 1]} : vector<8x256xf32> to vector<8x224xf32>
    %11 = vector.extract_strided_slice %5 {offsets = [0, 0], sizes = [8, 32], strides = [1, 1]} : vector<8x256xf32> to vector<8x32xf32>
    %12 = tpu.concatenate %10, %11 in 1 : vector<8x224xf32>, vector<8x32xf32> -> vector<8x256xf32>
    %13 = arith.mulf %4, %12 : vector<8x256xf32>
    %c0_6 = arith.constant 0 : index
    %c0_7 = arith.constant 0 : index
    %14 = vector.load %arg3[%c0_6, %c0_7] : memref<256x16xf32, #tpu.memory_space<vmem>>, vector<256x16xf32>
    %cst_8 = arith.constant dense<0.000000e+00> : vector<8x16xf32>
    %15 = tpu.matmul %13, %14, %cst_8 {dimension_numbers = #tpu.dot_dimension_numbers<[1], [0], [0], [1], [0, 0, 1, 1], [], []>} : vector<8x256xf32>, vector<256x16xf32>, vector<8x16xf32> -> vector<8x16xf32>
    %16 = vector.extract_strided_slice %5 {offsets = [0, 64], sizes = [8, 192], strides = [1, 1]} : vector<8x256xf32> to vector<8x192xf32>
    %17 = vector.extract_strided_slice %5 {offsets = [0, 0], sizes = [8, 64], strides = [1, 1]} : vector<8x256xf32> to vector<8x64xf32>
    %18 = tpu.concatenate %16, %17 in 1 : vector<8x192xf32>, vector<8x64xf32> -> vector<8x256xf32>
    %19 = arith.mulf %4, %18 : vector<8x256xf32>
    %c0_9 = arith.constant 0 : index
    %c0_10 = arith.constant 0 : index
    %20 = vector.load %arg3[%c0_9, %c0_10] : memref<256x16xf32, #tpu.memory_space<vmem>>, vector<256x16xf32>
    %cst_11 = arith.constant dense<0.000000e+00> : vector<8x16xf32>
    %21 = tpu.matmul %19, %20, %cst_11 {dimension_numbers = #tpu.dot_dimension_numbers<[1], [0], [0], [1], [0, 0, 1, 1], [], []>} : vector<8x256xf32>, vector<256x16xf32>, vector<8x16xf32> -> vector<8x16xf32>
    %22 = vector.extract_strided_slice %5 {offsets = [0, 96], sizes = [8, 160], strides = [1, 1]} : vector<8x256xf32> to vector<8x160xf32>
    %23 = vector.extract_strided_slice %5 {offsets = [0, 0], sizes = [8, 96], strides = [1, 1]} : vector<8x256xf32> to vector<8x96xf32>
    %24 = tpu.concatenate %22, %23 in 1 : vector<8x160xf32>, vector<8x96xf32> -> vector<8x256xf32>
    %25 = arith.mulf %4, %24 : vector<8x256xf32>
    %c0_12 = arith.constant 0 : index
    %c0_13 = arith.constant 0 : index
    %26 = vector.load %arg3[%c0_12, %c0_13] : memref<256x16xf32, #tpu.memory_space<vmem>>, vector<256x16xf32>
    %cst_14 = arith.constant dense<0.000000e+00> : vector<8x16xf32>
    %27 = tpu.matmul %25, %26, %cst_14 {dimension_numbers = #tpu.dot_dimension_numbers<[1], [0], [0], [1], [0, 0, 1, 1], [], []>} : vector<8x256xf32>, vector<256x16xf32>, vector<8x16xf32> -> vector<8x16xf32>
    %28 = vector.extract_strided_slice %5 {offsets = [0, 128], sizes = [8, 128], strides = [1, 1]} : vector<8x256xf32> to vector<8x128xf32>
    %29 = vector.extract_strided_slice %5 {offsets = [0, 0], sizes = [8, 128], strides = [1, 1]} : vector<8x256xf32> to vector<8x128xf32>
    %30 = tpu.concatenate %28, %29 in 1 : vector<8x128xf32>, vector<8x128xf32> -> vector<8x256xf32>
    %31 = arith.mulf %4, %30 : vector<8x256xf32>
    %c0_15 = arith.constant 0 : index
    %c0_16 = arith.constant 0 : index
    %32 = vector.load %arg3[%c0_15, %c0_16] : memref<256x16xf32, #tpu.memory_space<vmem>>, vector<256x16xf32>
    %cst_17 = arith.constant dense<0.000000e+00> : vector<8x16xf32>
    %33 = tpu.matmul %31, %32, %cst_17 {dimension_numbers = #tpu.dot_dimension_numbers<[1], [0], [0], [1], [0, 0, 1, 1], [], []>} : vector<8x256xf32>, vector<256x16xf32>, vector<8x16xf32> -> vector<8x16xf32>
    %34 = vector.extract_strided_slice %5 {offsets = [0, 160], sizes = [8, 96], strides = [1, 1]} : vector<8x256xf32> to vector<8x96xf32>
    %35 = vector.extract_strided_slice %5 {offsets = [0, 0], sizes = [8, 160], strides = [1, 1]} : vector<8x256xf32> to vector<8x160xf32>
    %36 = tpu.concatenate %34, %35 in 1 : vector<8x96xf32>, vector<8x160xf32> -> vector<8x256xf32>
    %37 = arith.mulf %4, %36 : vector<8x256xf32>
    %c0_18 = arith.constant 0 : index
    %c0_19 = arith.constant 0 : index
    %38 = vector.load %arg3[%c0_18, %c0_19] : memref<256x16xf32, #tpu.memory_space<vmem>>, vector<256x16xf32>
    %cst_20 = arith.constant dense<0.000000e+00> : vector<8x16xf32>
    %39 = tpu.matmul %37, %38, %cst_20 {dimension_numbers = #tpu.dot_dimension_numbers<[1], [0], [0], [1], [0, 0, 1, 1], [], []>} : vector<8x256xf32>, vector<256x16xf32>, vector<8x16xf32> -> vector<8x16xf32>
    %40 = vector.extract_strided_slice %5 {offsets = [0, 192], sizes = [8, 64], strides = [1, 1]} : vector<8x256xf32> to vector<8x64xf32>
    %41 = vector.extract_strided_slice %5 {offsets = [0, 0], sizes = [8, 192], strides = [1, 1]} : vector<8x256xf32> to vector<8x192xf32>
    %42 = tpu.concatenate %40, %41 in 1 : vector<8x64xf32>, vector<8x192xf32> -> vector<8x256xf32>
    %43 = arith.mulf %4, %42 : vector<8x256xf32>
    %c0_21 = arith.constant 0 : index
    %c0_22 = arith.constant 0 : index
    %44 = vector.load %arg3[%c0_21, %c0_22] : memref<256x16xf32, #tpu.memory_space<vmem>>, vector<256x16xf32>
    %cst_23 = arith.constant dense<0.000000e+00> : vector<8x16xf32>
    %45 = tpu.matmul %43, %44, %cst_23 {dimension_numbers = #tpu.dot_dimension_numbers<[1], [0], [0], [1], [0, 0, 1, 1], [], []>} : vector<8x256xf32>, vector<256x16xf32>, vector<8x16xf32> -> vector<8x16xf32>
    %46 = vector.extract_strided_slice %5 {offsets = [0, 224], sizes = [8, 32], strides = [1, 1]} : vector<8x256xf32> to vector<8x32xf32>
    %47 = vector.extract_strided_slice %5 {offsets = [0, 0], sizes = [8, 224], strides = [1, 1]} : vector<8x256xf32> to vector<8x224xf32>
    %48 = tpu.concatenate %46, %47 in 1 : vector<8x32xf32>, vector<8x224xf32> -> vector<8x256xf32>
    %49 = arith.mulf %4, %48 : vector<8x256xf32>
    %c0_24 = arith.constant 0 : index
    %c0_25 = arith.constant 0 : index
    %50 = vector.load %arg3[%c0_24, %c0_25] : memref<256x16xf32, #tpu.memory_space<vmem>>, vector<256x16xf32>
    %cst_26 = arith.constant dense<0.000000e+00> : vector<8x16xf32>
    %51 = tpu.matmul %49, %50, %cst_26 {dimension_numbers = #tpu.dot_dimension_numbers<[1], [0], [0], [1], [0, 0, 1, 1], [], []>} : vector<8x256xf32>, vector<256x16xf32>, vector<8x16xf32> -> vector<8x16xf32>
    %52 = tpu.concatenate %9, %15, %21, %27, %33, %39, %45, %51 in 1 : vector<8x16xf32>, vector<8x16xf32>, vector<8x16xf32>, vector<8x16xf32>, vector<8x16xf32>, vector<8x16xf32>, vector<8x16xf32>, vector<8x16xf32> -> vector<8x128xf32>
    %53 = math.exp %52 : vector<8x128xf32>
    %54 = vector.extract_strided_slice %53 {offsets = [0, 16], sizes = [8, 112], strides = [1, 1]} : vector<8x128xf32> to vector<8x112xf32>
    %55 = vector.extract_strided_slice %53 {offsets = [0, 0], sizes = [8, 16], strides = [1, 1]} : vector<8x128xf32> to vector<8x16xf32>
    %56 = tpu.concatenate %54, %55 in 1 : vector<8x112xf32>, vector<8x16xf32> -> vector<8x128xf32>
    %57 = arith.addf %53, %56 : vector<8x128xf32>
    %58 = vector.extract_strided_slice %57 {offsets = [0, 32], sizes = [8, 96], strides = [1, 1]} : vector<8x128xf32> to vector<8x96xf32>
    %59 = vector.extract_strided_slice %57 {offsets = [0, 0], sizes = [8, 32], strides = [1, 1]} : vector<8x128xf32> to vector<8x32xf32>
    %60 = tpu.concatenate %58, %59 in 1 : vector<8x96xf32>, vector<8x32xf32> -> vector<8x128xf32>
    %61 = arith.addf %57, %60 : vector<8x128xf32>
    %62 = vector.extract_strided_slice %61 {offsets = [0, 64], sizes = [8, 64], strides = [1, 1]} : vector<8x128xf32> to vector<8x64xf32>
    %63 = vector.extract_strided_slice %61 {offsets = [0, 0], sizes = [8, 64], strides = [1, 1]} : vector<8x128xf32> to vector<8x64xf32>
    %64 = tpu.concatenate %62, %63 in 1 : vector<8x64xf32>, vector<8x64xf32> -> vector<8x128xf32>
    %65 = arith.addf %61, %64 : vector<8x128xf32>
    %cst_27 = arith.constant 9.99999993E-9 : f32
    %66 = vector.broadcast %cst_27 : f32 to vector<8x128xf32>
    %67 = arith.addf %65, %66 : vector<8x128xf32>
    %68 = arith.divf %53, %67 : vector<8x128xf32>
    %69 = vector.extract_strided_slice %68 {offsets = [0, 0], sizes = [8, 16], strides = [1, 1]} : vector<8x128xf32> to vector<8x16xf32>
    %c0_28 = arith.constant 0 : index
    %c0_29 = arith.constant 0 : index
    %70 = vector.load %arg4[%c0_28, %c0_29] : memref<16x256xf32, #tpu.memory_space<vmem>>, vector<16x256xf32>
    %cst_30 = arith.constant dense<0.000000e+00> : vector<8x256xf32>
    %71 = tpu.matmul %69, %70, %cst_30 {dimension_numbers = #tpu.dot_dimension_numbers<[1], [0], [0], [1], [0, 0, 1, 1], [], []>} : vector<8x16xf32>, vector<16x256xf32>, vector<8x256xf32> -> vector<8x256xf32>
    %72 = arith.mulf %71, %6 : vector<8x256xf32>
    %73 = vector.extract_strided_slice %68 {offsets = [0, 16], sizes = [8, 16], strides = [1, 1]} : vector<8x128xf32> to vector<8x16xf32>
    %c0_31 = arith.constant 0 : index
    %c0_32 = arith.constant 0 : index
    %74 = vector.load %arg4[%c0_31, %c0_32] : memref<16x256xf32, #tpu.memory_space<vmem>>, vector<16x256xf32>
    %cst_33 = arith.constant dense<0.000000e+00> : vector<8x256xf32>
    %75 = tpu.matmul %73, %74, %cst_33 {dimension_numbers = #tpu.dot_dimension_numbers<[1], [0], [0], [1], [0, 0, 1, 1], [], []>} : vector<8x16xf32>, vector<16x256xf32>, vector<8x256xf32> -> vector<8x256xf32>
    %76 = vector.extract_strided_slice %6 {offsets = [0, 32], sizes = [8, 224], strides = [1, 1]} : vector<8x256xf32> to vector<8x224xf32>
    %77 = vector.extract_strided_slice %6 {offsets = [0, 0], sizes = [8, 32], strides = [1, 1]} : vector<8x256xf32> to vector<8x32xf32>
    %78 = tpu.concatenate %76, %77 in 1 : vector<8x224xf32>, vector<8x32xf32> -> vector<8x256xf32>
    %79 = arith.mulf %75, %78 : vector<8x256xf32>
    %80 = arith.addf %72, %79 : vector<8x256xf32>
    %81 = vector.extract_strided_slice %68 {offsets = [0, 32], sizes = [8, 16], strides = [1, 1]} : vector<8x128xf32> to vector<8x16xf32>
    %c0_34 = arith.constant 0 : index
    %c0_35 = arith.constant 0 : index
    %82 = vector.load %arg4[%c0_34, %c0_35] : memref<16x256xf32, #tpu.memory_space<vmem>>, vector<16x256xf32>
    %cst_36 = arith.constant dense<0.000000e+00> : vector<8x256xf32>
    %83 = tpu.matmul %81, %82, %cst_36 {dimension_numbers = #tpu.dot_dimension_numbers<[1], [0], [0], [1], [0, 0, 1, 1], [], []>} : vector<8x16xf32>, vector<16x256xf32>, vector<8x256xf32> -> vector<8x256xf32>
    %84 = vector.extract_strided_slice %6 {offsets = [0, 64], sizes = [8, 192], strides = [1, 1]} : vector<8x256xf32> to vector<8x192xf32>
    %85 = vector.extract_strided_slice %6 {offsets = [0, 0], sizes = [8, 64], strides = [1, 1]} : vector<8x256xf32> to vector<8x64xf32>
    %86 = tpu.concatenate %84, %85 in 1 : vector<8x192xf32>, vector<8x64xf32> -> vector<8x256xf32>
    %87 = arith.mulf %83, %86 : vector<8x256xf32>
    %88 = arith.addf %80, %87 : vector<8x256xf32>
    %89 = vector.extract_strided_slice %68 {offsets = [0, 48], sizes = [8, 16], strides = [1, 1]} : vector<8x128xf32> to vector<8x16xf32>
    %c0_37 = arith.constant 0 : index
    %c0_38 = arith.constant 0 : index
    %90 = vector.load %arg4[%c0_37, %c0_38] : memref<16x256xf32, #tpu.memory_space<vmem>>, vector<16x256xf32>
    %cst_39 = arith.constant dense<0.000000e+00> : vector<8x256xf32>
    %91 = tpu.matmul %89, %90, %cst_39 {dimension_numbers = #tpu.dot_dimension_numbers<[1], [0], [0], [1], [0, 0, 1, 1], [], []>} : vector<8x16xf32>, vector<16x256xf32>, vector<8x256xf32> -> vector<8x256xf32>
    %92 = vector.extract_strided_slice %6 {offsets = [0, 96], sizes = [8, 160], strides = [1, 1]} : vector<8x256xf32> to vector<8x160xf32>
    %93 = vector.extract_strided_slice %6 {offsets = [0, 0], sizes = [8, 96], strides = [1, 1]} : vector<8x256xf32> to vector<8x96xf32>
    %94 = tpu.concatenate %92, %93 in 1 : vector<8x160xf32>, vector<8x96xf32> -> vector<8x256xf32>
    %95 = arith.mulf %91, %94 : vector<8x256xf32>
    %96 = arith.addf %88, %95 : vector<8x256xf32>
    %97 = vector.extract_strided_slice %68 {offsets = [0, 64], sizes = [8, 16], strides = [1, 1]} : vector<8x128xf32> to vector<8x16xf32>
    %c0_40 = arith.constant 0 : index
    %c0_41 = arith.constant 0 : index
    %98 = vector.load %arg4[%c0_40, %c0_41] : memref<16x256xf32, #tpu.memory_space<vmem>>, vector<16x256xf32>
    %cst_42 = arith.constant dense<0.000000e+00> : vector<8x256xf32>
    %99 = tpu.matmul %97, %98, %cst_42 {dimension_numbers = #tpu.dot_dimension_numbers<[1], [0], [0], [1], [0, 0, 1, 1], [], []>} : vector<8x16xf32>, vector<16x256xf32>, vector<8x256xf32> -> vector<8x256xf32>
    %100 = vector.extract_strided_slice %6 {offsets = [0, 128], sizes = [8, 128], strides = [1, 1]} : vector<8x256xf32> to vector<8x128xf32>
    %101 = vector.extract_strided_slice %6 {offsets = [0, 0], sizes = [8, 128], strides = [1, 1]} : vector<8x256xf32> to vector<8x128xf32>
    %102 = tpu.concatenate %100, %101 in 1 : vector<8x128xf32>, vector<8x128xf32> -> vector<8x256xf32>
    %103 = arith.mulf %99, %102 : vector<8x256xf32>
    %104 = arith.addf %96, %103 : vector<8x256xf32>
    %105 = vector.extract_strided_slice %68 {offsets = [0, 80], sizes = [8, 16], strides = [1, 1]} : vector<8x128xf32> to vector<8x16xf32>
    %c0_43 = arith.constant 0 : index
    %c0_44 = arith.constant 0 : index
    %106 = vector.load %arg4[%c0_43, %c0_44] : memref<16x256xf32, #tpu.memory_space<vmem>>, vector<16x256xf32>
    %cst_45 = arith.constant dense<0.000000e+00> : vector<8x256xf32>
    %107 = tpu.matmul %105, %106, %cst_45 {dimension_numbers = #tpu.dot_dimension_numbers<[1], [0], [0], [1], [0, 0, 1, 1], [], []>} : vector<8x16xf32>, vector<16x256xf32>, vector<8x256xf32> -> vector<8x256xf32>
    %108 = vector.extract_strided_slice %6 {offsets = [0, 160], sizes = [8, 96], strides = [1, 1]} : vector<8x256xf32> to vector<8x96xf32>
    %109 = vector.extract_strided_slice %6 {offsets = [0, 0], sizes = [8, 160], strides = [1, 1]} : vector<8x256xf32> to vector<8x160xf32>
    %110 = tpu.concatenate %108, %109 in 1 : vector<8x96xf32>, vector<8x160xf32> -> vector<8x256xf32>
    %111 = arith.mulf %107, %110 : vector<8x256xf32>
    %112 = arith.addf %104, %111 : vector<8x256xf32>
    %113 = vector.extract_strided_slice %68 {offsets = [0, 96], sizes = [8, 16], strides = [1, 1]} : vector<8x128xf32> to vector<8x16xf32>
    %c0_46 = arith.constant 0 : index
    %c0_47 = arith.constant 0 : index
    %114 = vector.load %arg4[%c0_46, %c0_47] : memref<16x256xf32, #tpu.memory_space<vmem>>, vector<16x256xf32>
    %cst_48 = arith.constant dense<0.000000e+00> : vector<8x256xf32>
    %115 = tpu.matmul %113, %114, %cst_48 {dimension_numbers = #tpu.dot_dimension_numbers<[1], [0], [0], [1], [0, 0, 1, 1], [], []>} : vector<8x16xf32>, vector<16x256xf32>, vector<8x256xf32> -> vector<8x256xf32>
    %116 = vector.extract_strided_slice %6 {offsets = [0, 192], sizes = [8, 64], strides = [1, 1]} : vector<8x256xf32> to vector<8x64xf32>
    %117 = vector.extract_strided_slice %6 {offsets = [0, 0], sizes = [8, 192], strides = [1, 1]} : vector<8x256xf32> to vector<8x192xf32>
    %118 = tpu.concatenate %116, %117 in 1 : vector<8x64xf32>, vector<8x192xf32> -> vector<8x256xf32>
    %119 = arith.mulf %115, %118 : vector<8x256xf32>
    %120 = arith.addf %112, %119 : vector<8x256xf32>
    %121 = vector.extract_strided_slice %68 {offsets = [0, 112], sizes = [8, 16], strides = [1, 1]} : vector<8x128xf32> to vector<8x16xf32>
    %c0_49 = arith.constant 0 : index
    %c0_50 = arith.constant 0 : index
    %122 = vector.load %arg4[%c0_49, %c0_50] : memref<16x256xf32, #tpu.memory_space<vmem>>, vector<16x256xf32>
    %cst_51 = arith.constant dense<0.000000e+00> : vector<8x256xf32>
    %123 = tpu.matmul %121, %122, %cst_51 {dimension_numbers = #tpu.dot_dimension_numbers<[1], [0], [0], [1], [0, 0, 1, 1], [], []>} : vector<8x16xf32>, vector<16x256xf32>, vector<8x256xf32> -> vector<8x256xf32>
    %124 = vector.extract_strided_slice %6 {offsets = [0, 224], sizes = [8, 32], strides = [1, 1]} : vector<8x256xf32> to vector<8x32xf32>
    %125 = vector.extract_strided_slice %6 {offsets = [0, 0], sizes = [8, 224], strides = [1, 1]} : vector<8x256xf32> to vector<8x224xf32>
    %126 = tpu.concatenate %124, %125 in 1 : vector<8x32xf32>, vector<8x224xf32> -> vector<8x256xf32>
    %127 = arith.mulf %123, %126 : vector<8x256xf32>
    %128 = arith.addf %120, %127 : vector<8x256xf32>
    %129 = arith.truncf %128 : vector<8x256xf32> to vector<8x256xbf16>
    %c0_52 = arith.constant 0 : index
    %c0_53 = arith.constant 0 : index
    %130 = vector.load %arg5[%c0_52, %c0_53] : memref<256x128xbf16, #tpu.memory_space<vmem>>, vector<256x128xbf16>
    %cst_54 = arith.constant dense<0.000000e+00> : vector<8x128xf32>
    %131 = tpu.matmul %129, %130, %cst_54 {dimension_numbers = #tpu.dot_dimension_numbers<[1], [0], [0], [1], [0, 0, 1, 1], [], []>} : vector<8x256xbf16>, vector<256x128xbf16>, vector<8x128xf32> -> vector<8x128xf32>
    %c0_55 = arith.constant 0 : index
    %c0_56 = arith.constant 0 : index
    %132 = vector.load %arg6[%c0_55, %c0_56] : memref<1x128xf32, #tpu.memory_space<vmem>>, vector<1x128xf32>
    %133 = vector.broadcast %132 : vector<1x128xf32> to vector<8x128xf32>
    %134 = arith.addf %131, %133 : vector<8x128xf32>
    %135 = math.tanh %134 : vector<8x128xf32>
    %c0_57 = arith.constant 0 : index
    %c0_58 = arith.constant 0 : index
    %136 = vector.load %arg7[%c0_57, %c0_58] : memref<1x128xf32, #tpu.memory_space<vmem>>, vector<1x128xf32>
    %137 = vector.broadcast %136 : vector<1x128xf32> to vector<8x128xf32>
    %138 = arith.mulf %135, %137 : vector<8x128xf32>
    %c0_59 = arith.constant 0 : index
    %c0_60 = arith.constant 0 : index
    %139 = vector.load %arg8[%c0_59, %c0_60] : memref<128x8xf32, #tpu.memory_space<vmem>>, vector<128x8xf32>
    %cst_61 = arith.constant dense<0.000000e+00> : vector<8x8xf32>
    %140 = tpu.matmul %138, %139, %cst_61 {dimension_numbers = #tpu.dot_dimension_numbers<[1], [0], [0], [1], [0, 0, 1, 1], [], []>} : vector<8x128xf32>, vector<128x8xf32>, vector<8x8xf32> -> vector<8x8xf32>
    %c0_62 = arith.constant 0 : index
    %c0_63 = arith.constant 0 : index
    %141 = vector.load %arg10[%c0_62, %c0_63] : memref<1x1xf32, #tpu.memory_space<vmem>>, vector<1x1xf32>
    %142 = vector.broadcast %141 : vector<1x1xf32> to vector<8x8xf32>
    %143 = arith.addf %140, %142 : vector<8x8xf32>
    %144 = math.exp %143 : vector<8x8xf32>
    %cst_64 = arith.constant dense<0.000000e+00> : vector<8xf32>
    %145 = vector.multi_reduction <add>, %144, %cst_64 [1] : vector<8x8xf32> to vector<8xf32>
    %146 = vector.shape_cast %145 : vector<8xf32> to vector<8x1xf32>
    %cst_65 = arith.constant 9.99999993E-9 : f32
    %147 = vector.broadcast %cst_65 : f32 to vector<8x1xf32>
    %148 = arith.addf %146, %147 : vector<8x1xf32>
    %149 = vector.broadcast %148 : vector<8x1xf32> to vector<8x8xf32>
    %150 = arith.divf %144, %149 : vector<8x8xf32>
    %c0_66 = arith.constant 0 : index
    %c0_67 = arith.constant 0 : index
    %151 = vector.load %arg9[%c0_66, %c0_67] : memref<8x256xf32, #tpu.memory_space<vmem>>, vector<8x256xf32>
    %cst_68 = arith.constant dense<0.000000e+00> : vector<8x256xf32>
    %152 = tpu.matmul %150, %151, %cst_68 {dimension_numbers = #tpu.dot_dimension_numbers<[1], [0], [0], [1], [0, 0, 1, 1], [], []>} : vector<8x8xf32>, vector<8x256xf32>, vector<8x256xf32> -> vector<8x256xf32>
    %153 = arith.mulf %152, %128 : vector<8x256xf32>
    %154 = vector.extract_strided_slice %153 {offsets = [0, 32], sizes = [8, 224], strides = [1, 1]} : vector<8x256xf32> to vector<8x224xf32>
    %155 = vector.extract_strided_slice %153 {offsets = [0, 0], sizes = [8, 32], strides = [1, 1]} : vector<8x256xf32> to vector<8x32xf32>
    %156 = tpu.concatenate %154, %155 in 1 : vector<8x224xf32>, vector<8x32xf32> -> vector<8x256xf32>
    %157 = arith.addf %153, %156 : vector<8x256xf32>
    %158 = vector.extract_strided_slice %157 {offsets = [0, 64], sizes = [8, 192], strides = [1, 1]} : vector<8x256xf32> to vector<8x192xf32>
    %159 = vector.extract_strided_slice %157 {offsets = [0, 0], sizes = [8, 64], strides = [1, 1]} : vector<8x256xf32> to vector<8x64xf32>
    %160 = tpu.concatenate %158, %159 in 1 : vector<8x192xf32>, vector<8x64xf32> -> vector<8x256xf32>
    %161 = arith.addf %157, %160 : vector<8x256xf32>
    %162 = vector.extract_strided_slice %161 {offsets = [0, 128], sizes = [8, 128], strides = [1, 1]} : vector<8x256xf32> to vector<8x128xf32>
    %163 = vector.extract_strided_slice %161 {offsets = [0, 0], sizes = [8, 128], strides = [1, 1]} : vector<8x256xf32> to vector<8x128xf32>
    %164 = tpu.concatenate %162, %163 in 1 : vector<8x128xf32>, vector<8x128xf32> -> vector<8x256xf32>
    %165 = arith.addf %161, %164 : vector<8x256xf32>
    %166 = vector.extract_strided_slice %165 {offsets = [0, 0], sizes = [8, 32], strides = [1, 1]} : vector<8x256xf32> to vector<8x32xf32>
    %c0_69 = arith.constant 0 : index
    %c0_70 = arith.constant 0 : index
    %167 = vector.load %arg11[%c0_69, %c0_70] : memref<8x32xf32, #tpu.memory_space<vmem>>, vector<8x32xf32>
    tpu.vector_store %arg11[%c0_69, %c0_70], %166 {strides = array<i32>} : memref<8x32xf32, #tpu.memory_space<vmem>>, vector<8x32xf32>,
    return
  }
  func.func @transform_0(%arg0: i32) -> (i32, i32) {
    %c0_i32 = arith.constant 0 : i32
    %c0_i32_0 = arith.constant 0 : i32
    return %arg0, %c0_i32 : i32, i32
  }
  func.func @transform_1(%arg0: i32) -> (i32, i32) {
    %c0_i32 = arith.constant 0 : i32
    %c0_i32_0 = arith.constant 0 : i32
    %c0_i32_1 = arith.constant 0 : i32
    return %c0_i32, %c0_i32_0 : i32, i32
  }
  func.func @transform_2(%arg0: i32) -> (i32, i32) {
    %c0_i32 = arith.constant 0 : i32
    %c0_i32_0 = arith.constant 0 : i32
    %c0_i32_1 = arith.constant 0 : i32
    return %c0_i32, %c0_i32_0 : i32, i32
  }
  func.func @transform_3(%arg0: i32) -> (i32, i32) {
    %c0_i32 = arith.constant 0 : i32
    %c0_i32_0 = arith.constant 0 : i32
    %c0_i32_1 = arith.constant 0 : i32
    return %c0_i32, %c0_i32_0 : i32, i32
  }
  func.func @transform_4(%arg0: i32) -> (i32, i32) {
    %c0_i32 = arith.constant 0 : i32
    %c0_i32_0 = arith.constant 0 : i32
    %c0_i32_1 = arith.constant 0 : i32
    return %c0_i32, %c0_i32_0 : i32, i32
  }
  func.func @transform_5(%arg0: i32) -> (i32, i32) {
    %c0_i32 = arith.constant 0 : i32
    %c0_i32_0 = arith.constant 0 : i32
    %c0_i32_1 = arith.constant 0 : i32
    return %c0_i32, %c0_i32_0 : i32, i32
  }
  func.func @transform_6(%arg0: i32) -> (i32, i32) {
    %c0_i32 = arith.constant 0 : i32
    %c0_i32_0 = arith.constant 0 : i32
    %c0_i32_1 = arith.constant 0 : i32
    return %c0_i32, %c0_i32_0 : i32, i32
  }
  func.func @transform_7(%arg0: i32) -> (i32, i32) {
    %c0_i32 = arith.constant 0 : i32
    %c0_i32_0 = arith.constant 0 : i32
    %c0_i32_1 = arith.constant 0 : i32
    return %c0_i32, %c0_i32_0 : i32, i32
  }
  func.func @transform_8(%arg0: i32) -> (i32, i32) {
    %c0_i32 = arith.constant 0 : i32
    %c0_i32_0 = arith.constant 0 : i32
    %c0_i32_1 = arith.constant 0 : i32
    return %c0_i32, %c0_i32_0 : i32, i32
  }
  func.func @transform_9(%arg0: i32) -> (i32, i32) {
    %c0_i32 = arith.constant 0 : i32
    %c0_i32_0 = arith.constant 0 : i32
    %c0_i32_1 = arith.constant 0 : i32
    return %c0_i32, %c0_i32_0 : i32, i32
  }
  func.func @transform_10(%arg0: i32) -> (i32, i32) {
    %c0_i32 = arith.constant 0 : i32
    %c0_i32_0 = arith.constant 0 : i32
    return %arg0, %c0_i32 : i32, i32
  }
}

</mosaic_0001>

<bundles_post_ra>
// kernel: tpu_custom_call.1
= control target key start
LH: loop header
LB: loop body
LE: loop exit
PB: predicated region body
PF: predicated region fallthrough
CT: control target
= control target key end

     0   :  { %s4080_s0 = inlined_call_operand.vmem [shape: f32[8,256], index: 0, kind: input, shape index: {}]   ;;  %s4081_s1 = inlined_call_operand.hbm [shape: bf16[256,768], index: 1, kind: input, shape index: {}]   ;;  %s4082_s2 = inlined_call_operand.vmem [shape: f32[256,16], index: 2, kind: input, shape index: {}]   ;;  %s4083_s3 = inlined_call_operand.vmem [shape: f32[16,256], index: 3, kind: input, shape index: {}]   ;;  %s4084_s4 = inlined_call_operand.vmem [shape: bf16[256,128], index: 4, kind: input, shape index: {}]   ;;  %s4085_s5 = inlined_call_operand.vmem [shape: f32[1,128], index: 5, kind: input, shape index: {}]   ;;  %s4086_s6 = inlined_call_operand.vmem [shape: f32[1,128], index: 6, kind: input, shape index: {}]   ;;  %s4087_s7 = inlined_call_operand.vmem [shape: f32[128,8], index: 7, kind: input, shape index: {}]   ;;  %s4088_s8 = inlined_call_operand.vmem [shape: f32[8,256], index: 8, kind: input, shape index: {}]   ;;  %s4089_s9 = inlined_call_operand.<no memory space> [shape: f32[1,1], index: 9, kind: input, shape index: {}]   ;;  %s4090_s10 = inlined_call_operand.hbm [shape: f32[8,32], index: 10, kind: output, shape index: {}]  }
   0x1   :  { %v15_v0 = vstv %s4089_s9 }
   0x2   :  { %16 = vst [vmem:[#allocation2] sm:$0x1] %v15_v0 }
   0x3   :  { %17 = vsyncpa [#allocation4], 0 }
   0x4   :  { %18 = vsyncpa [#allocation5], 0  ;;  %s3237_s15 = smov [#allocation3]  }
   0x5   :  { %s26_s16 = sshll.u32 %s3237_s15, 4  ;;  %s27_s16 = int_to_ptr.vmem [resolvable:$true] %s26_s16 }
   0x6   :  { %s3201_s17 = scalar_lea.vmem %s27_s16, 12288  ;;  %p3206_p1 = scmp.lt.s32.totalorder %s27_s16, %s27_s16 }
   0x7   :  { %p3202_p0 = scmp.ne.s32.totalorder %s27_s16, %s3201_s17  ;;  %p3207_p2 = scmp.lt.s32.totalorder %s3201_s17, %s3201_s17 }
   0x9   :  { %p3208_p3 = por %p3207_p2, %p3206_p1 }
   0xb   :  { %p3209_p4 = pnand %p3208_p3, %p3202_p0 }
   0xd   :  { %3212 = shalt.err (!%p3209_p4)
}
   0xe   :  { %s3238_s18 = smov 384   ;;  %s3239_s19 = smov 24  }
   0xf   :  { %32 = dma.hbm_to_vmem [thread:$0]  %s4081_s1, 12288, %s27_s16, [#allocation4], %s3238_s18, %s3238_s18, %s3239_s19  }
  0x10   :  { %3233 = dma.done.wait [#allocation4], 12288  }
  0x11   :  { %3234 = vsyncadd [#allocation4], 4294955008  ;;  %v3023_v1 = vld [vmem:[#allocation3 + $0x154] ss:$24 sps:$4 sm:$0xff]   ;;  %v3027_v3 = vld [vmem:[#allocation3 + $0x150] ss:$24 sps:$4 sm:$0xff]  }
  0x12   :  { %v3025_v2 = vld [vmem:[#allocation3 + $0x15c] ss:$24 sps:$4 sm:$0xff]   ;;  %633 = vmatprep.subr.bf16.mxu0 %v3023_v1  ;;  %v3028_v4 = vld [vmem:[#allocation3 + $0x158] ss:$24 sps:$4 sm:$0xff]   ;;  %v3031_v6 = vld [vmem:[#allocation3 + $0x12c] ss:$24 sps:$4 sm:$0xff]  }
  0x13   :  { %674 = vmatprep.subr.bf16.mxu1 %v3025_v2  ;;  %v3029_v5 = vld [vmem:[#allocation3 + $0x124] ss:$24 sps:$4 sm:$0xff]   ;;  %634 = vmatpush1.bf16.msra.mxu0 %v3027_v3  ;;  %v3033_v7 = vld [vmem:[#allocation3 + $0x120] ss:$24 sps:$4 sm:$0xff]   ;;  %v3035_v9 = vld [vmem:[#allocation3 + $0xf4] ss:$24 sps:$4 sm:$0xff]  }
  0x14   :  { %675 = vmatpush1.bf16.msra.mxu1 %v3028_v4  ;;  %635 = vmatprep.subr.bf16.mxu0 %v3029_v5  ;;  %v3034_v8 = vld [vmem:[#allocation3 + $0x128] ss:$24 sps:$4 sm:$0xff]   ;;  %v3037_v10 = vld [vmem:[#allocation3 + $0xfc] ss:$24 sps:$4 sm:$0xff]   ;;  %v3040_v12 = vld [vmem:[#allocation3 + $0xf8] ss:$24 sps:$4 sm:$0xff]  }
  0x15   :  { %676 = vmatprep.subr.bf16.mxu1 %v3031_v6  ;;  %v3039_v11 = vld [vmem:[#allocation3 + $0xf0] ss:$24 sps:$4 sm:$0xff]   ;;  %v3041_v13 = vld [vmem:[#allocation3 + $0xc4] ss:$24 sps:$4 sm:$0xff]   ;;  %v3045_v15 = vld [vmem:[#allocation3 + $0xc0] ss:$24 sps:$4 sm:$0xff]  }
  0x16   :  { %v3043_v14 = vld [vmem:[#allocation3 + $0xcc] ss:$24 sps:$4 sm:$0xff]   ;;  %v3046_v16 = vld [vmem:[#allocation3 + $0xc8] ss:$24 sps:$4 sm:$0xff]   ;;  %v3049_v18 = vld [vmem:[#allocation3 + $0x9c] ss:$24 sps:$4 sm:$0xff]  }
  0x17   :  { %636 = vmatpush1.bf16.msra.mxu0 %v3033_v7  ;;  %v3047_v17 = vld [vmem:[#allocation3 + $0x94] ss:$24 sps:$4 sm:$0xff]   ;;  %v3051_v19 = vld [vmem:[#allocation3 + $0x90] ss:$24 sps:$4 sm:$0xff]   ;;  %v3053_v21 = vld [vmem:[#allocation3 + $0x64] ss:$24 sps:$4 sm:$0xff]  }
  0x18   :  { %677 = vmatpush1.bf16.msra.mxu1 %v3034_v8  ;;  %637 = vmatprep.subr.bf16.mxu0 %v3035_v9  ;;  %v3052_v20 = vld [vmem:[#allocation3 + $0x98] ss:$24 sps:$4 sm:$0xff]   ;;  %v3055_v22 = vld [vmem:[#allocation3 + $0x6c] ss:$24 sps:$4 sm:$0xff]   ;;  %v3058_v24 = vld [vmem:[#allocation3 + $0x68] ss:$24 sps:$4 sm:$0xff]  }
  0x19   :  { %678 = vmatprep.subr.bf16.mxu1 %v3037_v10  ;;  %v3057_v23 = vld [vmem:[#allocation3 + $0x60] ss:$24 sps:$4 sm:$0xff]   ;;  %v3059_v25 = vld [vmem:[#allocation3 + $0x34] ss:$24 sps:$4 sm:$0xff]   ;;  %v3063_v27 = vld [vmem:[#allocation3 + $0x30] ss:$24 sps:$4 sm:$0xff]  }
  0x1a   :  { %v3061_v26 = vld [vmem:[#allocation3 + $0x3c] ss:$24 sps:$4 sm:$0xff]   ;;  %v3064_v28 = vld [vmem:[#allocation3 + $0x38] ss:$24 sps:$4 sm:$0xff]   ;;  %v3067_v30 = vld [vmem:[#allocation3 + $0xc] ss:$24 sps:$4 sm:$0xff]  }
  0x1b   :  { %638 = vmatpush1.bf16.msra.mxu0 %v3039_v11  ;;  %v3065_v29 = vld [vmem:[#allocation3 + $0x4] ss:$24 sps:$4 sm:$0xff]   ;;  %v3069_v31 = vld [vmem:[#allocation3] ss:$24 sps:$4 sm:$0xff]   ;;  %v3071_v33 = vld [vmem:[#allocation3 + $0x2d4] ss:$24 sps:$4 sm:$0xff]  }
  0x1c   :  { %679 = vmatpush1.bf16.msra.mxu1 %v3040_v12  ;;  %639 = vmatprep.subr.bf16.mxu0 %v3041_v13  ;;  %v3070_v32 = vld [vmem:[#allocation3 + $0x8] ss:$24 sps:$4 sm:$0xff]   ;;  %v3073_v34 = vld [vmem:[#allocation3 + $0x2dc] ss:$24 sps:$4 sm:$0xff]   ;;  %v3076_v36 = vld [vmem:[#allocation3 + $0x2d8] ss:$24 sps:$4 sm:$0xff]  }
  0x1d   :  { %680 = vmatprep.subr.bf16.mxu1 %v3043_v14  ;;  %v3075_v35 = vld [vmem:[#allocation3 + $0x2d0] ss:$24 sps:$4 sm:$0xff]   ;;  %v3077_v37 = vld [vmem:[#allocation3 + $0x2a4] ss:$24 sps:$4 sm:$0xff]   ;;  %v3081_v39 = vld [vmem:[#allocation3 + $0x2a0] ss:$24 sps:$4 sm:$0xff]  }
  0x1e   :  { %v3079_v38 = vld [vmem:[#allocation3 + $0x2ac] ss:$24 sps:$4 sm:$0xff]   ;;  %v3082_v40 = vld [vmem:[#allocation3 + $0x2a8] ss:$24 sps:$4 sm:$0xff]   ;;  %v3085_v42 = vld [vmem:[#allocation3 + $0x27c] ss:$24 sps:$4 sm:$0xff]  }
  0x1f   :  { %640 = vmatpush1.bf16.msra.mxu0 %v3045_v15  ;;  %v3083_v41 = vld [vmem:[#allocation3 + $0x274] ss:$24 sps:$4 sm:$0xff]   ;;  %v3087_v43 = vld [vmem:[#allocation3 + $0x270] ss:$24 sps:$4 sm:$0xff]   ;;  %v3089_v45 = vld [vmem:[#allocation3 + $0x244] ss:$24 sps:$4 sm:$0xff]  }
  0x20   :  { %681 = vmatpush1.bf16.msra.mxu1 %v3046_v16  ;;  %641 = vmatprep.subr.bf16.mxu0 %v3047_v17  ;;  %v3088_v44 = vld [vmem:[#allocation3 + $0x278] ss:$24 sps:$4 sm:$0xff]   ;;  %v3091_v46 = vld [vmem:[#allocation3 + $0x24c] ss:$24 sps:$4 sm:$0xff]   ;;  %v3094_v50 = vld [vmem:[#allocation3 + $0x248] ss:$24 sps:$4 sm:$0xff]  }
  0x21   :  { %682 = vmatprep.subr.bf16.mxu1 %v3049_v18  ;;  %v54_v47 = vld [vmem:[%s4080_s0 + $0x8] sm:$0xff]  ;;  %v3093_v49 = vld [vmem:[#allocation3 + $0x240] ss:$24 sps:$4 sm:$0xff]   ;;  %v3097_v52 = vld [vmem:[#allocation3 + $0x21c] ss:$24 sps:$4 sm:$0xff]   ;;  %s3241_s21 = smov 96  }
  0x22   :  { %v56_v48 = vpack.c.bf16 %v54_v47, %v54_v47  ;;  %v3095_v51 = vld [vmem:[#allocation3 + $0x214] ss:$24 sps:$4 sm:$0xff]   ;;  %v3099_v53 = vld [vmem:[#allocation3 + $0x210] ss:$24 sps:$4 sm:$0xff]   ;;  %v3101_v55 = vld [vmem:[#allocation3 + $0x1e4] ss:$24 sps:$4 sm:$0xff]  }
  0x23   :  { %642 = vmatpush1.bf16.msra.mxu0 %v3051_v19  ;;  %v3100_v54 = vld [vmem:[#allocation3 + $0x218] ss:$24 sps:$4 sm:$0xff]   ;;  %v3103_v56 = vld [vmem:[#allocation3 + $0x1ec] ss:$24 sps:$4 sm:$0xff]   ;;  %v3106_v58 = vld [vmem:[#allocation3 + $0x1e8] ss:$24 sps:$4 sm:$0xff]  }
  0x24   :  { %683 = vmatpush1.bf16.msra.mxu1 %v3052_v20  ;;  %643 = vmatprep.subr.bf16.mxu0 %v3053_v21  ;;  %v3105_v57 = vld [vmem:[#allocation3 + $0x1e0] ss:$24 sps:$4 sm:$0xff]   ;;  %v3107_v59 = vld [vmem:[#allocation3 + $0x1b4] ss:$24 sps:$4 sm:$0xff]   ;;  %v3111_v61 = vld [vmem:[#allocation3 + $0x1b0] ss:$24 sps:$4 sm:$0xff]  }
  0x25   :  { %684 = vmatprep.subr.bf16.mxu1 %v3055_v22  ;;  %665 = vmatprep.mubr.bf16.mxu0 %v56_v48  ;;  %v3109_v60 = vld [vmem:[#allocation3 + $0x1bc] ss:$24 sps:$4 sm:$0xff]   ;;  %v3112_v62 = vld [vmem:[#allocation3 + $0x1b8] ss:$24 sps:$4 sm:$0xff]   ;;  %v3115_v0 = vld [vmem:[#allocation3 + $0x18c] ss:$24 sps:$4 sm:$0xff]  }
  0x26   :  { %706 = vmatprep.mubr.bf16.mxu1 %v56_v48  ;;  %v3113_v63 = vld [vmem:[#allocation3 + $0x184] ss:$24 sps:$4 sm:$0xff]   ;;  %v3117_v1 = vld [vmem:[#allocation3 + $0x180] ss:$24 sps:$4 sm:$0xff]   ;;  %v3333_v7 = vld [vmem:[%s4082_s2 + $0xf0] sm:$0xff]  ;;  %s3242_s1 = smov 32  }
  0x27   :  { %644 = vmatpush1.bf16.msra.mxu0 %v3057_v23  ;;  %v3118_v2 = vld [vmem:[#allocation3 + $0x188] ss:$24 sps:$4 sm:$0xff]   ;;  %v3321_v4 = vld [vmem:[%s4082_s2 + $0xf8] sm:$0xff]  ;;  %v3339_v8 = vld [vmem:[%s4082_s2 + $0x70] sm:$0xff]  ;;  %vm948_vm0 = vcmask 523264   ;;  %vm866_vm1 = vcmask 785408  }
  0x28   :  { %685 = vmatpush1.bf16.msra.mxu1 %v3058_v24  ;;  %645 = vmatprep.subr.bf16.mxu0 %v3059_v25  ;;  %v53_v3 = vld [vmem:[%s4080_s0] sm:$0xff]  ;;  %v3328_v6 = vld [vmem:[%s4082_s2 + $0x78] sm:$0xff]  ;;  %v3344_v9 = vld [vmem:[%s4082_s2 + $0xe8] sm:$0xff]  ;;  %vm1030_vm2 = vcmask 261120   ;;  %s3243_s9 = smov 16   ;;  %s3244_s22 = smov 48  }
  0x29   :  { %686 = vmatprep.subr.bf16.mxu1 %v3061_v26  ;;  %v3323_v5 = vpack.c.bf16 %v53_v3, %v53_v3  ;;  %v3351_v10 = vld [vmem:[%s4082_s2 + $0x68] sm:$0xff]  ;;  %v3357_v11 = vld [vmem:[%s4082_s2 + $0xe0] sm:$0xff]  ;;  %v3369_v13 = vld [vmem:[%s4082_s2 + $0xd8] sm:$0xff]  ;;  %s3245_s23 = smov 80   ;;  %s3246_s24 = smov 112   ;;  %vm1424_vm3 = vcmask 130048  }
  0x2a   :  { %v3363_v12 = vld [vmem:[%s4082_s2 + $0x60] sm:$0xff]  ;;  %v3377_v14 = vld [vmem:[%s4082_s2 + $0x58] sm:$0xff]  ;;  %v3383_v15 = vld [vmem:[%s4082_s2 + $0xd0] sm:$0xff]  ;;  %vm1427_vm4 = vcmask 392192   ;;  %vm1430_vm5 = vcmask 654336   ;;  %vm1433_vm6 = vcmask 916480  }
  0x2b   :  { %646 = vmatpush1.bf16.msra.mxu0 %v3063_v27  ;;  %v3389_v16 = vld [vmem:[%s4082_s2 + $0x50] sm:$0xff]  ;;  %v3395_v17 = vld [vmem:[%s4082_s2 + $0xc8] sm:$0xff]  ;;  %v3407_v19 = vld [vmem:[%s4082_s2 + $0xc0] sm:$0xff]  ;;  %vm3248_vm7 = vmmov 0   ;;  %vm2401_vm8 = vcmask 64512  }
  0x2c   :  { %687 = vmatpush1.bf16.msra.mxu1 %v3064_v28  ;;  %647 = vmatprep.subr.bf16.mxu0 %v3065_v29  ;;  %v3401_v18 = vld [vmem:[%s4082_s2 + $0x48] sm:$0xff]  ;;  %v3413_v20 = vld [vmem:[%s4082_s2 + $0x40] sm:$0xff]  ;;  %v3419_v21 = vld [vmem:[%s4082_s2 + $0xb8] sm:$0xff] }
  0x2d   :  { %688 = vmatprep.subr.bf16.mxu1 %v3067_v30  ;;  %v3425_v22 = vld [vmem:[%s4082_s2 + $0x38] sm:$0xff]  ;;  %v3431_v23 = vld [vmem:[%s4082_s2 + $0xb0] sm:$0xff]  ;;  %v3443_v25 = vld [vmem:[%s4082_s2 + $0xa8] sm:$0xff] }
  0x2e   :  { %v3437_v24 = vld [vmem:[%s4082_s2 + $0x30] sm:$0xff]  ;;  %v3449_v26 = vld [vmem:[%s4082_s2 + $0x28] sm:$0xff]  ;;  %v3455_v27 = vld [vmem:[%s4082_s2 + $0xa0] sm:$0xff] }
  0x2f   :  { %648 = vmatpush1.bf16.msra.mxu0 %v3069_v31  ;;  %v3461_v28 = vld [vmem:[%s4082_s2 + $0x20] sm:$0xff]  ;;  %v3467_v29 = vld [vmem:[%s4082_s2 + $0x98] sm:$0xff]  ;;  %v3481_v31 = vld [vmem:[%s4082_s2 + $0x90] sm:$0xff] }
  0x30   :  { %689 = vmatpush1.bf16.msra.mxu1 %v3070_v32  ;;  %649 = vmatprep.subr.bf16.mxu0 %v3071_v33  ;;  %v3473_v30 = vld [vmem:[%s4082_s2 + $0x18] sm:$0xff]  ;;  %v3487_v32 = vld [vmem:[%s4082_s2 + $0x10] sm:$0xff]  ;;  %v3493_v33 = vld [vmem:[%s4082_s2 + $0x88] sm:$0xff] }
  0x31   :  { %690 = vmatprep.subr.bf16.mxu1 %v3073_v34  ;;  %v3499_v34 = vld [vmem:[%s4082_s2 + $0x8] sm:$0xff] }
  0x32   :  { %v3136_v47 = vld [vmem:[#allocation3 + $0x74] ss:$24 sps:$4 sm:$0xff]  }
  0x33   :  { %650 = vmatpush2.bf16.msra.mxu0 %v3075_v35  ;;  %v3505_v35 = vld [vmem:[%s4082_s2 + $0x80] sm:$0xff]  ;;  %v3166_v3 = vld [vmem:[#allocation3 + $0x194] ss:$24 sps:$4 sm:$0xff]  }
  0x34   :  { %691 = vmatpush2.bf16.msra.mxu1 %v3076_v36  ;;  %651 = vmatprep.subr.bf16.mxu0 %v3077_v37  ;;  %v3511_v36 = vld [vmem:[%s4082_s2] sm:$0xff]  ;;  %s3240_s2 = smov 64  }
  0x35   :  { %692 = vmatprep.subr.bf16.mxu1 %v3079_v38  ;;  %v3119_v37 = vld [vmem:[#allocation3 + $0x160] ss:$24 sps:$4 sm:$0xff]   ;;  %v3121_v38 = vld [vmem:[#allocation3 + $0x164] ss:$24 sps:$4 sm:$0xff]  }
  0x37   :  { %652 = vmatpush2.bf16.msra.mxu0 %v3081_v39  ;;  %v3124_v39 = vld [vmem:[#allocation3 + $0x134] ss:$24 sps:$4 sm:$0xff]  }
  0x38   :  { %693 = vmatpush2.bf16.msra.mxu1 %v3082_v40  ;;  %653 = vmatprep.subr.bf16.mxu0 %v3083_v41  ;;  %v3122_v40 = vld [vmem:[#allocation3 + $0x130] ss:$24 sps:$4 sm:$0xff]   ;;  %v3127_v41 = vld [vmem:[#allocation3 + $0x104] ss:$24 sps:$4 sm:$0xff]  }
  0x39   :  { %694 = vmatprep.subr.bf16.mxu1 %v3085_v42  ;;  %v3125_v42 = vld [vmem:[#allocation3 + $0x100] ss:$24 sps:$4 sm:$0xff]  }
  0x3b   :  { %654 = vmatpush2.bf16.msra.mxu0 %v3087_v43  ;;  %v3130_v43 = vld [vmem:[#allocation3 + $0xd4] ss:$24 sps:$4 sm:$0xff]  }
  0x3c   :  { %695 = vmatpush2.bf16.msra.mxu1 %v3088_v44  ;;  %655 = vmatprep.subr.bf16.mxu0 %v3089_v45  ;;  %v3128_v44 = vld [vmem:[#allocation3 + $0xd0] ss:$24 sps:$4 sm:$0xff]   ;;  %v3133_v45 = vld [vmem:[#allocation3 + $0xa4] ss:$24 sps:$4 sm:$0xff]  }
  0x3d   :  { %696 = vmatprep.subr.bf16.mxu1 %v3091_v46  ;;  %v3131_v46 = vld [vmem:[#allocation3 + $0xa0] ss:$24 sps:$4 sm:$0xff]  }
  0x3f   :  { %656 = vmatpush2.bf16.msra.mxu0 %v3093_v49  ;;  %v3139_v49 = vld [vmem:[#allocation3 + $0x44] ss:$24 sps:$4 sm:$0xff]  }
  0x40   :  { %697 = vmatpush2.bf16.msra.mxu1 %v3094_v50  ;;  %657 = vmatprep.subr.bf16.mxu0 %v3095_v51  ;;  %v3137_v50 = vld [vmem:[#allocation3 + $0x40] ss:$24 sps:$4 sm:$0xff]   ;;  %v3142_v51 = vld [vmem:[#allocation3 + $0x14] ss:$24 sps:$4 sm:$0xff]  }
  0x41   :  { %698 = vmatprep.subr.bf16.mxu1 %v3097_v52  ;;  %v3140_v52 = vld [vmem:[#allocation3 + $0x10] ss:$24 sps:$4 sm:$0xff]  }
  0x43   :  { %658 = vmatpush2.bf16.msra.mxu0 %v3099_v53  ;;  %v3145_v53 = vld [vmem:[#allocation3 + $0x2e4] ss:$24 sps:$4 sm:$0xff]  }
  0x44   :  { %699 = vmatpush2.bf16.msra.mxu1 %v3100_v54  ;;  %659 = vmatprep.subr.bf16.mxu0 %v3101_v55  ;;  %v3143_v54 = vld [vmem:[#allocation3 + $0x2e0] ss:$24 sps:$4 sm:$0xff]   ;;  %v3148_v55 = vld [vmem:[#allocation3 + $0x2b4] ss:$24 sps:$4 sm:$0xff]  }
  0x45   :  { %700 = vmatprep.subr.bf16.mxu1 %v3103_v56  ;;  %v3146_v56 = vld [vmem:[#allocation3 + $0x2b0] ss:$24 sps:$4 sm:$0xff]  }
  0x47   :  { %660 = vmatpush2.bf16.msra.mxu0 %v3105_v57  ;;  %v3151_v57 = vld [vmem:[#allocation3 + $0x284] ss:$24 sps:$4 sm:$0xff]  }
  0x48   :  { %701 = vmatpush2.bf16.msra.mxu1 %v3106_v58  ;;  %661 = vmatprep.subr.bf16.mxu0 %v3107_v59  ;;  %v3149_v58 = vld [vmem:[#allocation3 + $0x280] ss:$24 sps:$4 sm:$0xff]   ;;  %v3154_v59 = vld [vmem:[#allocation3 + $0x254] ss:$24 sps:$4 sm:$0xff]  }
  0x49   :  { %702 = vmatprep.subr.bf16.mxu1 %v3109_v60  ;;  %v3152_v60 = vld [vmem:[#allocation3 + $0x250] ss:$24 sps:$4 sm:$0xff]  }
  0x4b   :  { %662 = vmatpush2.bf16.msra.mxu0 %v3111_v61  ;;  %v3157_v61 = vld [vmem:[#allocation3 + $0x224] ss:$24 sps:$4 sm:$0xff]  }
  0x4c   :  { %703 = vmatpush2.bf16.msra.mxu1 %v3112_v62  ;;  %663 = vmatprep.subr.bf16.mxu0 %v3113_v63  ;;  %v3155_v62 = vld [vmem:[#allocation3 + $0x220] ss:$24 sps:$4 sm:$0xff]   ;;  %v3160_v63 = vld [vmem:[#allocation3 + $0x1f4] ss:$24 sps:$4 sm:$0xff]  }
  0x4d   :  { %704 = vmatprep.subr.bf16.mxu1 %v3115_v0  ;;  %v3158_v0 = vld [vmem:[#allocation3 + $0x1f0] ss:$24 sps:$4 sm:$0xff]  }
  0x4f   :  { %664 = vmatpush2.bf16.msra.mxu0 %v3117_v1  ;;  %v3163_v1 = vld [vmem:[#allocation3 + $0x1c4] ss:$24 sps:$4 sm:$0xff]  }
  0x50   :  { %705 = vmatpush2.bf16.msra.mxu1 %v3118_v2  ;;  %715 = vmatprep.subr.bf16.mxu0 %v3121_v38  ;;  %v3161_v2 = vld [vmem:[#allocation3 + $0x1c0] ss:$24 sps:$4 sm:$0xff]  }
  0x51   :  { %2653 = vmatprep.subr.mxu1 %v3321_v4 }
  0x52   :  { %666 = vmatmul.mubr.bf16.vlgmr.msra.gmra.mxu0 %v3323_v5 }
  0x53   :  { %707 = vmatmul.mubr.bf16.vlgmr.msra.gmra.mxu1 %v3323_v5  ;;  %747 = vmatprep.mubr.bf16.mxu0 %v56_v48  ;;  %v3134_v48 = vld [vmem:[#allocation3 + $0x70] ss:$24 sps:$4 sm:$0xff]  }
  0x54   :  { %2654 = vmatpush3.msra.mxu1 %v3328_v6  ;;  %716 = vmatpush1.bf16.msra.mxu0 %v3119_v37  ;;  %v3164_v37 = vld [vmem:[#allocation3 + $0x190] ss:$24 sps:$4 sm:$0xff]  }
  0x55   :  { %2655 = vmatprep.subr.mxu1 %v3333_v7  ;;  %717 = vmatprep.subr.bf16.mxu0 %v3124_v39 }
  0x56   :  { %2656 = vmatpush3.msra.mxu1 %v3339_v8 }
  0x57   :  { %2657 = vmatprep.subr.mxu1 %v3344_v9 }
  0x58   :  { %2658 = vmatpush3.msra.mxu1 %v3351_v10  ;;  %718 = vmatpush1.bf16.msra.mxu0 %v3122_v40 }
  0x59   :  { %2659 = vmatprep.subr.mxu1 %v3357_v11  ;;  %719 = vmatprep.subr.bf16.mxu0 %v3127_v41 }
  0x5a   :  { %2660 = vmatpush3.msra.mxu1 %v3363_v12 }
  0x5b   :  { %2661 = vmatprep.subr.mxu1 %v3369_v13 }
  0x5c   :  { %2662 = vmatpush3.msra.mxu1 %v3377_v14  ;;  %720 = vmatpush1.bf16.msra.mxu0 %v3125_v42 }
  0x5d   :  { %2663 = vmatprep.subr.mxu1 %v3383_v15  ;;  %721 = vmatprep.subr.bf16.mxu0 %v3130_v43 }
  0x5e   :  { %2664 = vmatpush3.msra.mxu1 %v3389_v16 }
  0x5f   :  { %2665 = vmatprep.subr.mxu1 %v3395_v17 }
  0x60   :  { %2666 = vmatpush3.msra.mxu1 %v3401_v18  ;;  %722 = vmatpush1.bf16.msra.mxu0 %v3128_v44 }
  0x61   :  { %2667 = vmatprep.subr.mxu1 %v3407_v19  ;;  %723 = vmatprep.subr.bf16.mxu0 %v3133_v45 }
  0x62   :  { %2668 = vmatpush3.msra.mxu1 %v3413_v20 }
  0x63   :  { %2669 = vmatprep.subr.mxu1 %v3419_v21 }
  0x64   :  { %2670 = vmatpush3.msra.mxu1 %v3425_v22  ;;  %724 = vmatpush1.bf16.msra.mxu0 %v3131_v46 }
  0x65   :  { %2671 = vmatprep.subr.mxu1 %v3431_v23  ;;  %725 = vmatprep.subr.bf16.mxu0 %v3136_v47 }
  0x66   :  { %2672 = vmatpush3.msra.mxu1 %v3437_v24 }
  0x67   :  { %2673 = vmatprep.subr.mxu1 %v3443_v25 }
  0x68   :  { %2674 = vmatpush3.msra.mxu1 %v3449_v26  ;;  %726 = vmatpush1.bf16.msra.mxu0 %v3134_v48 }
  0x69   :  { %2675 = vmatprep.subr.mxu1 %v3455_v27  ;;  %727 = vmatprep.subr.bf16.mxu0 %v3139_v49 }
  0x6a   :  { %2676 = vmatpush3.msra.mxu1 %v3461_v28 }
  0x6b   :  { %2677 = vmatprep.subr.mxu1 %v3467_v29 }
  0x6c   :  { %2678 = vmatpush3.msra.mxu1 %v3473_v30  ;;  %728 = vmatpush1.bf16.msra.mxu0 %v3137_v50 }
  0x6d   :  { %2679 = vmatprep.subr.mxu1 %v3481_v31  ;;  %729 = vmatprep.subr.bf16.mxu0 %v3142_v51 }
  0x6e   :  { %2680 = vmatpush3.msra.mxu1 %v3487_v32 }
  0x6f   :  { %2681 = vmatprep.subr.mxu1 %v3493_v33 }
  0x70   :  { %2682 = vmatpush3.msra.mxu1 %v3499_v34  ;;  %730 = vmatpush1.bf16.msra.mxu0 %v3140_v52 }
  0x71   :  { %2683 = vmatprep.subr.mxu1 %v3505_v35  ;;  %731 = vmatprep.subr.bf16.mxu0 %v3145_v53 }
  0x72   :  { %2684 = vmatpush3.msra.mxu1 %v3511_v36 }
  0x73   :  { %2688 = vmatprep.subr.mxu1 %v3321_v4 }
  0x74   :  { %732 = vmatpush2.bf16.msra.mxu0 %v3143_v54 }
  0x75   :  { %733 = vmatprep.subr.bf16.mxu0 %v3148_v55 }
  0x78   :  { %734 = vmatpush2.bf16.msra.mxu0 %v3146_v56 }
  0x79   :  { %735 = vmatprep.subr.bf16.mxu0 %v3151_v57 }
  0x7c   :  { %736 = vmatpush2.bf16.msra.mxu0 %v3149_v58 }
  0x7d   :  { %737 = vmatprep.subr.bf16.mxu0 %v3154_v59 }
  0x80   :  { %738 = vmatpush2.bf16.msra.mxu0 %v3152_v60 }
  0x81   :  { %739 = vmatprep.subr.bf16.mxu0 %v3157_v61 }
  0x84   :  { %740 = vmatpush2.bf16.msra.mxu0 %v3155_v62 }
  0x85   :  { %741 = vmatprep.subr.bf16.mxu0 %v3160_v63 }
  0x88   :  { %742 = vmatpush2.bf16.msra.mxu0 %v3158_v0 }
  0x89   :  { %743 = vmatprep.subr.bf16.mxu0 %v3163_v1 }
  0x8c   :  { %744 = vmatpush2.bf16.msra.mxu0 %v3161_v2 }
  0x8d   :  { %745 = vmatprep.subr.bf16.mxu0 %v3166_v3 }
  0x90   :  { %746 = vmatpush2.bf16.msra.mxu0 %v3164_v37 }
  0x91   :  { %2723 = vmatprep.subr.mxu0 %v3321_v4 }
  0x93   :  { %748 = vmatmul.mubr.bf16.vlgmr.msra.gmra.mxu0 %v3323_v5 }
  0x94   :  { %2724 = vmatpush3.msra.mxu0 %v3328_v6 }
  0x95   :  { %2725 = vmatprep.subr.mxu0 %v3333_v7 }
  0x96   :  { %2726 = vmatpush3.msra.mxu0 %v3339_v8 }
  0x97   :  { %2727 = vmatprep.subr.mxu0 %v3344_v9 }
  0x98   :  { %2728 = vmatpush3.msra.mxu0 %v3351_v10 }
  0x99   :  { %2729 = vmatprep.subr.mxu0 %v3357_v11 }
  0x9a   :  { %2730 = vmatpush3.msra.mxu0 %v3363_v12 }
  0x9b   :  { %2731 = vmatprep.subr.mxu0 %v3369_v13 }
  0x9c   :  { %2732 = vmatpush3.msra.mxu0 %v3377_v14 }
  0x9d   :  { %2733 = vmatprep.subr.mxu0 %v3383_v15 }
  0x9e   :  { %2734 = vmatpush3.msra.mxu0 %v3389_v16 }
  0x9f   :  { %2735 = vmatprep.subr.mxu0 %v3395_v17 }
  0xa0   :  { %2736 = vmatpush3.msra.mxu0 %v3401_v18 }
  0xa1   :  { %2737 = vmatprep.subr.mxu0 %v3407_v19 }
  0xa2   :  { %2738 = vmatpush3.msra.mxu0 %v3413_v20 }
  0xa3   :  { %2739 = vmatprep.subr.mxu0 %v3419_v21 }
  0xa4   :  { %2740 = vmatpush3.msra.mxu0 %v3425_v22 }
  0xa5   :  { %2741 = vmatprep.subr.mxu0 %v3431_v23 }
  0xa6   :  { %2742 = vmatpush3.msra.mxu0 %v3437_v24 }
  0xa7   :  { %2743 = vmatprep.subr.mxu0 %v3443_v25 }
  0xa8   :  { %2744 = vmatpush3.msra.mxu0 %v3449_v26 }
  0xa9   :  { %2745 = vmatprep.subr.mxu0 %v3455_v27 }
  0xaa   :  { %2746 = vmatpush3.msra.mxu0 %v3461_v28 }
  0xab   :  { %2747 = vmatprep.subr.mxu0 %v3467_v29 }
  0xac   :  { %2748 = vmatpush3.msra.mxu0 %v3473_v30 }
  0xad   :  { %2749 = vmatprep.subr.mxu0 %v3481_v31 }
  0xae   :  { %2750 = vmatpush3.msra.mxu0 %v3487_v32 }
  0xaf   :  { %2751 = vmatprep.subr.mxu0 %v3493_v33 }
  0xb0   :  { %2752 = vmatpush3.msra.mxu0 %v3499_v34 }
  0xb1   :  { %2753 = vmatprep.subr.mxu0 %v3505_v35 }
  0xb2   :  { %2754 = vmatpush3.msra.mxu0 %v3511_v36 }
  0xb3   :  { %2793 = vmatprep.subr.mxu0 %v3321_v4 }
 0x112   :  { %v3549_v5 = vpop.f32.mrf.mxu0 }
 0x113   :  { %v3551_v38 = vpop.f32.mrf.mxu1 }
 0x114   :  { %944 = vrot.lane.b32.xlu1 %v3551_v38, %s3240_s2  ;;  %862 = vrot.lane.b32.xlu0 %v3551_v38, %s3241_s21  ;;  %v3557_v39 = vpop.f32.mrf.mxu0  ;;  %v756_v44 = vmul.f32 %v3551_v38, %v3549_v5 }
 0x115   :  { %v3559_v40 = vpop.f32.mrf.mxu1  ;;  %v1109_v63 = vmul.f32 %v3551_v38, %v3557_v39 }
 0x116   :  { %v757_v41 = vmul.f32 %v3559_v40, %v3557_v39  ;;  %v671_v43 = vpop.f32.mrf.mxu0 }
 0x117   :  { %v712_v42 = vpop.f32.mrf.mxu1 }
 0x118   :  { %946 = vrot.lane.b32.xlu1 %v3559_v40, %s3240_s2  ;;  %864 = vrot.lane.b32.xlu0 %v3559_v40, %s3241_s21  ;;  %v672_v46 = vpop.f32.mrf.mxu0 }
 0x119   :  { %854 = vmatprep.mubr.f32.mxu1 %v757_v41  ;;  %v713_v45 = vpop.f32.mrf.mxu1  ;;  %v1108_v41 = vmul.f32 %v3559_v40, %v3549_v5 }
 0x11a   :  { %855 = vmatmul.mubr.f32.vlgmr.msra.gmra.mxu1 %v756_v44 }
 0x11b   :  { %2689 = vmatpush3.msra.mxu1 %v3328_v6 }
 0x11c   :  { %1028 = vrot.lane.b32.xlu1 %v3559_v40, %s3242_s1  ;;  %1026 = vrot.lane.b32.xlu0 %v3551_v38, %s3242_s1 }
 0x11d   :  { %2690 = vmatprep.subr.mxu1 %v3333_v7 }
 0x11e   :  { %2691 = vmatpush3.msra.mxu1 %v3339_v8 }
 0x11f   :  { %2692 = vmatprep.subr.mxu1 %v3344_v9 }
 0x120   :  { %2693 = vmatpush3.msra.mxu1 %v3351_v10 }
 0x121   :  { %2694 = vmatprep.subr.mxu1 %v3357_v11 }
 0x122   :  { %2695 = vmatpush3.msra.mxu1 %v3363_v12 }
 0x123   :  { %2696 = vmatprep.subr.mxu1 %v3369_v13 }
 0x124   :  { %2697 = vmatpush3.msra.mxu1 %v3377_v14 }
 0x125   :  { %2698 = vmatprep.subr.mxu1 %v3383_v15 }
 0x126   :  { %2699 = vmatpush3.msra.mxu1 %v3389_v16 }
 0x127   :  { %2700 = vmatprep.subr.mxu1 %v3395_v17 }
 0x128   :  { %2701 = vmatpush3.msra.mxu1 %v3401_v18 }
 0x129   :  { %2702 = vmatprep.subr.mxu1 %v3407_v19 }
 0x12a   :  { %2703 = vmatpush3.msra.mxu1 %v3413_v20 }
 0x12b   :  { %2704 = vmatprep.subr.mxu1 %v3419_v21 }
 0x12c   :  { %2705 = vmatpush3.msra.mxu1 %v3425_v22 }
 0x12d   :  { %2706 = vmatprep.subr.mxu1 %v3431_v23 }
 0x12e   :  { %2707 = vmatpush3.msra.mxu1 %v3437_v24 }
 0x12f   :  { %2708 = vmatprep.subr.mxu1 %v3443_v25 }
 0x130   :  { %2709 = vmatpush3.msra.mxu1 %v3449_v26 }
 0x131   :  { %2710 = vmatprep.subr.mxu1 %v3455_v27 }
 0x132   :  { %2711 = vmatpush3.msra.mxu1 %v3461_v28 }
 0x133   :  { %2712 = vmatprep.subr.mxu1 %v3467_v29 }
 0x134   :  { %2713 = vmatpush3.msra.mxu1 %v3473_v30 }
 0x135   :  { %2714 = vmatprep.subr.mxu1 %v3481_v31 }
 0x136   :  { %2715 = vmatpush3.msra.mxu1 %v3487_v32 }
 0x137   :  { %2716 = vmatprep.subr.mxu1 %v3493_v33 }
 0x138   :  { %2717 = vmatpush3.msra.mxu1 %v3499_v34 }
 0x139   :  { %2718 = vmatprep.subr.mxu1 %v3505_v35 }
 0x13a   :  { %2719 = vmatpush3.msra.mxu1 %v3511_v36 }
 0x13b   :  { %2758 = vmatprep.subr.mxu1 %v3321_v4 }
 0x153   :  { %v3664_v0 = vpop.f32.mrf.mxu0 }
 0x155   :  { %v3670_v1 = vpop.f32.mrf.mxu0 }
 0x157   :  { %v753_v2 = vpop.f32.mrf.mxu0 }
 0x159   :  { %v754_v3 = vpop.f32.mrf.mxu0 }
 0x186   :  { %v945_v47 = vpop.permute.xlu1 %944  ;;  %v863_v48 = vpop.permute.xlu0 %862 }
 0x18a   :  { %v947_v49 = vpop.permute.xlu1 %946  ;;  %v865_v50 = vpop.permute.xlu0 %864 }
 0x18b   :  { %v3606_v51 = vsel %vm948_vm0, %v945_v47, %v947_v49  ;;  %v3609_v52 = vsel %vm948_vm0, %v947_v49, %v945_v47  ;;  %v3612_v53 = vsel %vm866_vm1, %v863_v48, %v865_v50  ;;  %v3615_v54 = vsel %vm866_vm1, %v865_v50, %v863_v48 }
 0x18c   :  { %v954_v55 = vmul.f32 %v3606_v51, %v3549_v5  ;;  %v955_v56 = vmul.f32 %v3609_v52, %v3557_v39  ;;  %v872_v57 = vmul.f32 %v3612_v53, %v3549_v5  ;;  %v873_v58 = vmul.f32 %v3615_v54, %v3557_v39 }
 0x18d   :  { %v1181_v42 = vmul.f32 %v3612_v53, %v3557_v39  ;;  %v1253_v43 = vmul.f32 %v3606_v51, %v3557_v39  ;;  %v1252_v40 = vmul.f32 %v3609_v52, %v3549_v5  ;;  %v1180_v44 = vmul.f32 %v3615_v54, %v3549_v5 }
 0x18e   :  { %v3625_v59 = vpop.permute.xlu1 %1028  ;;  %v3627_v60 = vpop.permute.xlu0 %1026  ;;  %1020 = vmatprep.mubr.f32.mxu0 %v955_v56  ;;  %938 = vmatprep.mubr.f32.mxu1 %v873_v58  ;;  %v3844_v58 = vld [vmem:[%s4083_s3 + $0x10] sm:$0xff] }
 0x18f   :  { %v3632_v61 = vsel %vm1030_vm2, %v3625_v59, %v3627_v60  ;;  %1021 = vmatmul.mubr.f32.vlgmr.msra.gmra.mxu0 %v954_v55  ;;  %939 = vmatmul.mubr.f32.vlgmr.msra.gmra.mxu1 %v872_v57  ;;  %v3697_v37 = vsel %vm1030_vm2, %v3627_v60, %v3625_v59  ;;  %v3838_v57 = vld [vmem:[%s4083_s3 + $0x18] sm:$0xff]  ;;  %v3851_v59 = vld [vmem:[%s4083_s3 + $0x8] sm:$0xff]  ;;  %v3858_v60 = vld [vmem:[%s4083_s3] sm:$0xff] }
 0x190   :  { %v1037_v62 = vmul.f32 %v3632_v61, %v3557_v39  ;;  %2759 = vmatpush3.msra.mxu1 %v3328_v6  ;;  %2794 = vmatpush3.msra.mxu0 %v3328_v6  ;;  %v1036_v38 = vmul.f32 %v3697_v37, %v3549_v5  ;;  %v1325_v45 = vmul.f32 %v3697_v37, %v3557_v39 }
 0x191   :  { %2760 = vmatprep.subr.mxu1 %v3333_v7  ;;  %2795 = vmatprep.subr.mxu0 %v3333_v7 }
 0x192   :  { %1174 = vmatprep.mubr.f32.mxu0 %v1109_v63  ;;  %2761 = vmatpush3.msra.mxu1 %v3339_v8 }
 0x193   :  { %2796 = vmatpush3.msra.mxu0 %v3339_v8  ;;  %2762 = vmatprep.subr.mxu1 %v3344_v9 }
 0x194   :  { %1102 = vmatprep.mubr.f32.mxu1 %v1037_v62  ;;  %2797 = vmatprep.subr.mxu0 %v3344_v9 }
 0x195   :  { %2763 = vmatpush3.msra.mxu1 %v3351_v10  ;;  %2798 = vmatpush3.msra.mxu0 %v3351_v10 }
 0x196   :  { %2764 = vmatprep.subr.mxu1 %v3357_v11  ;;  %2799 = vmatprep.subr.mxu0 %v3357_v11 }
 0x197   :  { %2765 = vmatpush3.msra.mxu1 %v3363_v12  ;;  %2800 = vmatpush3.msra.mxu0 %v3363_v12 }
 0x198   :  { %2766 = vmatprep.subr.mxu1 %v3369_v13  ;;  %2801 = vmatprep.subr.mxu0 %v3369_v13 }
 0x199   :  { %2767 = vmatpush3.msra.mxu1 %v3377_v14  ;;  %2802 = vmatpush3.msra.mxu0 %v3377_v14 }
 0x19a   :  { %2768 = vmatprep.subr.mxu1 %v3383_v15  ;;  %2803 = vmatprep.subr.mxu0 %v3383_v15 }
 0x19b   :  { %2769 = vmatpush3.msra.mxu1 %v3389_v16  ;;  %2804 = vmatpush3.msra.mxu0 %v3389_v16 }
 0x19c   :  { %2770 = vmatprep.subr.mxu1 %v3395_v17  ;;  %2805 = vmatprep.subr.mxu0 %v3395_v17 }
 0x19d   :  { %2771 = vmatpush3.msra.mxu1 %v3401_v18  ;;  %2806 = vmatpush3.msra.mxu0 %v3401_v18 }
 0x19e   :  { %2772 = vmatprep.subr.mxu1 %v3407_v19  ;;  %2807 = vmatprep.subr.mxu0 %v3407_v19 }
 0x19f   :  { %2773 = vmatpush3.msra.mxu1 %v3413_v20  ;;  %2808 = vmatpush3.msra.mxu0 %v3413_v20 }
 0x1a0   :  { %2774 = vmatprep.subr.mxu1 %v3419_v21  ;;  %2809 = vmatprep.subr.mxu0 %v3419_v21 }
 0x1a1   :  { %2775 = vmatpush3.msra.mxu1 %v3425_v22  ;;  %2810 = vmatpush3.msra.mxu0 %v3425_v22 }
 0x1a2   :  { %2776 = vmatprep.subr.mxu1 %v3431_v23  ;;  %2811 = vmatprep.subr.mxu0 %v3431_v23 }
 0x1a3   :  { %2777 = vmatpush3.msra.mxu1 %v3437_v24  ;;  %2812 = vmatpush3.msra.mxu0 %v3437_v24 }
 0x1a4   :  { %2778 = vmatprep.subr.mxu1 %v3443_v25  ;;  %2813 = vmatprep.subr.mxu0 %v3443_v25 }
 0x1a5   :  { %2779 = vmatpush3.msra.mxu1 %v3449_v26  ;;  %2814 = vmatpush3.msra.mxu0 %v3449_v26 }
 0x1a6   :  { %2780 = vmatprep.subr.mxu1 %v3455_v27  ;;  %2815 = vmatprep.subr.mxu0 %v3455_v27 }
 0x1a7   :  { %2781 = vmatpush3.msra.mxu1 %v3461_v28  ;;  %2816 = vmatpush3.msra.mxu0 %v3461_v28 }
 0x1a8   :  { %2782 = vmatprep.subr.mxu1 %v3467_v29  ;;  %2817 = vmatprep.subr.mxu0 %v3467_v29 }
 0x1a9   :  { %2783 = vmatpush3.msra.mxu1 %v3473_v30  ;;  %2818 = vmatpush3.msra.mxu0 %v3473_v30 }
 0x1aa   :  { %2784 = vmatprep.subr.mxu1 %v3481_v31  ;;  %2819 = vmatprep.subr.mxu0 %v3481_v31 }
 0x1ab   :  { %2785 = vmatpush3.msra.mxu1 %v3487_v32  ;;  %2820 = vmatpush3.msra.mxu0 %v3487_v32 }
 0x1ac   :  { %2786 = vmatprep.subr.mxu1 %v3493_v33  ;;  %2821 = vmatprep.subr.mxu0 %v3493_v33 }
 0x1ad   :  { %2787 = vmatpush3.msra.mxu1 %v3499_v34  ;;  %2822 = vmatpush3.msra.mxu0 %v3499_v34 }
 0x1ae   :  { %2788 = vmatprep.subr.mxu1 %v3505_v35  ;;  %2823 = vmatprep.subr.mxu0 %v3505_v35 }
 0x1af   :  { %2789 = vmatpush3.msra.mxu1 %v3511_v36  ;;  %2824 = vmatpush3.msra.mxu0 %v3511_v36 }
 0x1b0   :  { %1103 = vmatmul.mubr.f32.vlgmr.msra.gmra.mxu1 %v1036_v38  ;;  %1175 = vmatmul.mubr.f32.vlgmr.msra.gmra.mxu0 %v1108_v41 }
 0x1b1   :  { %2828 = vmatprep.subr.mxu1 %v3321_v4  ;;  %2863 = vmatprep.subr.mxu0 %v3321_v4 }
 0x1b2   :  { %2829 = vmatpush3.msra.mxu1 %v3328_v6  ;;  %1246 = vmatprep.mubr.f32.mxu1 %v1181_v42 }
 0x1b3   :  { %2864 = vmatpush3.msra.mxu0 %v3328_v6  ;;  %1318 = vmatprep.mubr.f32.mxu0 %v1253_v43 }
 0x1b4   :  { %2830 = vmatprep.subr.mxu1 %v3333_v7  ;;  %2865 = vmatprep.subr.mxu0 %v3333_v7 }
 0x1b5   :  { %2831 = vmatpush3.msra.mxu1 %v3339_v8  ;;  %2866 = vmatpush3.msra.mxu0 %v3339_v8 }
 0x1b6   :  { %2832 = vmatprep.subr.mxu1 %v3344_v9  ;;  %2867 = vmatprep.subr.mxu0 %v3344_v9 }
 0x1b7   :  { %2833 = vmatpush3.msra.mxu1 %v3351_v10  ;;  %2868 = vmatpush3.msra.mxu0 %v3351_v10 }
 0x1b8   :  { %2834 = vmatprep.subr.mxu1 %v3357_v11  ;;  %2869 = vmatprep.subr.mxu0 %v3357_v11 }
 0x1b9   :  { %2835 = vmatpush3.msra.mxu1 %v3363_v12  ;;  %2870 = vmatpush3.msra.mxu0 %v3363_v12 }
 0x1ba   :  { %2836 = vmatprep.subr.mxu1 %v3369_v13  ;;  %2871 = vmatprep.subr.mxu0 %v3369_v13 }
 0x1bb   :  { %2837 = vmatpush3.msra.mxu1 %v3377_v14  ;;  %2872 = vmatpush3.msra.mxu0 %v3377_v14 }
 0x1bc   :  { %2838 = vmatprep.subr.mxu1 %v3383_v15  ;;  %2873 = vmatprep.subr.mxu0 %v3383_v15 }
 0x1bd   :  { %2839 = vmatpush3.msra.mxu1 %v3389_v16  ;;  %2874 = vmatpush3.msra.mxu0 %v3389_v16 }
 0x1be   :  { %2840 = vmatprep.subr.mxu1 %v3395_v17  ;;  %2875 = vmatprep.subr.mxu0 %v3395_v17 }
 0x1bf   :  { %2841 = vmatpush3.msra.mxu1 %v3401_v18  ;;  %2876 = vmatpush3.msra.mxu0 %v3401_v18 }
 0x1c0   :  { %2842 = vmatprep.subr.mxu1 %v3407_v19  ;;  %2877 = vmatprep.subr.mxu0 %v3407_v19 }
 0x1c1   :  { %2843 = vmatpush3.msra.mxu1 %v3413_v20  ;;  %2878 = vmatpush3.msra.mxu0 %v3413_v20 }
 0x1c2   :  { %2844 = vmatprep.subr.mxu1 %v3419_v21  ;;  %2879 = vmatprep.subr.mxu0 %v3419_v21 }
 0x1c3   :  { %2845 = vmatpush3.msra.mxu1 %v3425_v22  ;;  %2880 = vmatpush3.msra.mxu0 %v3425_v22 }
 0x1c4   :  { %2846 = vmatprep.subr.mxu1 %v3431_v23  ;;  %2881 = vmatprep.subr.mxu0 %v3431_v23 }
 0x1c5   :  { %2847 = vmatpush3.msra.mxu1 %v3437_v24  ;;  %2882 = vmatpush3.msra.mxu0 %v3437_v24 }
 0x1c6   :  { %2848 = vmatprep.subr.mxu1 %v3443_v25  ;;  %2883 = vmatprep.subr.mxu0 %v3443_v25 }
 0x1c7   :  { %2849 = vmatpush3.msra.mxu1 %v3449_v26  ;;  %2884 = vmatpush3.msra.mxu0 %v3449_v26 }
 0x1c8   :  { %2850 = vmatprep.subr.mxu1 %v3455_v27  ;;  %2885 = vmatprep.subr.mxu0 %v3455_v27 }
 0x1c9   :  { %2851 = vmatpush3.msra.mxu1 %v3461_v28  ;;  %2886 = vmatpush3.msra.mxu0 %v3461_v28 }
 0x1ca   :  { %2852 = vmatprep.subr.mxu1 %v3467_v29  ;;  %2887 = vmatprep.subr.mxu0 %v3467_v29 }
 0x1cb   :  { %2853 = vmatpush3.msra.mxu1 %v3473_v30  ;;  %2888 = vmatpush3.msra.mxu0 %v3473_v30 }
 0x1cc   :  { %2854 = vmatprep.subr.mxu1 %v3481_v31  ;;  %2889 = vmatprep.subr.mxu0 %v3481_v31 }
 0x1cd   :  { %2855 = vmatpush3.msra.mxu1 %v3487_v32  ;;  %2890 = vmatpush3.msra.mxu0 %v3487_v32 }
 0x1ce   :  { %2856 = vmatprep.subr.mxu1 %v3493_v33  ;;  %2891 = vmatprep.subr.mxu0 %v3493_v33 }
 0x1cf   :  { %2857 = vmatpush3.msra.mxu1 %v3499_v34  ;;  %2892 = vmatpush3.msra.mxu0 %v3499_v34 }
 0x1d0   :  { %2858 = vmatprep.subr.mxu1 %v3505_v35  ;;  %2893 = vmatprep.subr.mxu0 %v3505_v35 }
 0x1d1   :  { %2859 = vmatpush3.msra.mxu1 %v3511_v36  ;;  %2894 = vmatpush3.msra.mxu0 %v3511_v36 }
 0x1d2   :  { %1247 = vmatmul.mubr.f32.vlgmr.msra.gmra.mxu1 %v1180_v44  ;;  %1319 = vmatmul.mubr.f32.vlgmr.msra.gmra.mxu0 %v1252_v40 }
 0x1d3   :  { %2898 = vmatprep.subr.mxu1 %v3321_v4  ;;  %1390 = vmatprep.mubr.f32.mxu1 %v1325_v45  ;;  %v1324_v4 = vmul.f32 %v3632_v61, %v3549_v5  ;;  %v3247_v61 = vmov 0.0   ;;  %v3167_v45 = vld [vmem:[%s4084_s4 + $0x78] sm:$0xff]  }
 0x1d4   :  { %2899 = vmatpush3.msra.mxu1 %v3328_v6  ;;  %1490 = vmatprep.subr.mxu0 %v3838_v57 }
 0x1d5   :  { %2900 = vmatprep.subr.mxu1 %v3333_v7  ;;  %1491 = vmatpush1.msra.mxu0 %v3844_v58 }
 0x1d6   :  { %2901 = vmatpush3.msra.mxu1 %v3339_v8  ;;  %1492 = vmatprep.subr.mxu0 %v3851_v59 }
 0x1d7   :  { %2902 = vmatprep.subr.mxu1 %v3344_v9  ;;  %1493 = vmatpush1.msra.mxu0 %v3858_v60 }
 0x1d8   :  { %2903 = vmatpush3.msra.mxu1 %v3351_v10  ;;  %1526 = vmatprep.mubr.f32.mxu0 %v3247_v61 }
 0x1d9   :  { %2904 = vmatprep.subr.mxu1 %v3357_v11  ;;  %1657 = vmatprep.subr.mxu0 %v3838_v57 }
 0x1da   :  { %2905 = vmatpush3.msra.mxu1 %v3363_v12  ;;  %v2685_v6 = vpop.f32.mrf.mxu1 }
 0x1db   :  { %2906 = vmatprep.subr.mxu1 %v3369_v13 }
 0x1dc   :  { %2907 = vmatpush3.msra.mxu1 %v3377_v14  ;;  %v2686_v7 = vpop.f32.mrf.mxu1 }
 0x1dd   :  { %2908 = vmatprep.subr.mxu1 %v3383_v15 }
 0x1de   :  { %2909 = vmatpush3.msra.mxu1 %v3389_v16 }
 0x1df   :  { %2910 = vmatprep.subr.mxu1 %v3395_v17 }
 0x1e0   :  { %2911 = vmatpush3.msra.mxu1 %v3401_v18 }
 0x1e1   :  { %2912 = vmatprep.subr.mxu1 %v3407_v19 }
 0x1e2   :  { %2913 = vmatpush3.msra.mxu1 %v3413_v20 }
 0x1e3   :  { %2914 = vmatprep.subr.mxu1 %v3419_v21 }
 0x1e4   :  { %2915 = vmatpush3.msra.mxu1 %v3425_v22 }
 0x1e5   :  { %2916 = vmatprep.subr.mxu1 %v3431_v23 }
 0x1e6   :  { %2917 = vmatpush3.msra.mxu1 %v3437_v24 }
 0x1e7   :  { %2918 = vmatprep.subr.mxu1 %v3443_v25 }
 0x1e8   :  { %2919 = vmatpush3.msra.mxu1 %v3449_v26 }
 0x1e9   :  { %2920 = vmatprep.subr.mxu1 %v3455_v27 }
 0x1ea   :  { %2921 = vmatpush3.msra.mxu1 %v3461_v28 }
 0x1eb   :  { %2922 = vmatprep.subr.mxu1 %v3467_v29 }
 0x1ec   :  { %2923 = vmatpush3.msra.mxu1 %v3473_v30  ;;  %v2687_v30 = vadd.f32 %v2686_v7, %v2685_v6  ;;  %v3169_v7 = vld [vmem:[%s4084_s4 + $0x70] sm:$0xff]  }
 0x1ed   :  { %2924 = vmatprep.subr.mxu1 %v3481_v31 }
 0x1ee   :  { %2925 = vmatpush3.msra.mxu1 %v3487_v32 }
 0x1ef   :  { %2926 = vmatprep.subr.mxu1 %v3493_v33 }
 0x1f0   :  { %2927 = vmatpush3.msra.mxu1 %v3499_v34 }
 0x1f1   :  { %2928 = vmatprep.subr.mxu1 %v3505_v35 }
 0x1f2   :  { %2929 = vmatpush3.msra.mxu1 %v3511_v36 }
 0x1f3   :  { %1391 = vmatmul.mubr.f32.vlgmr.msra.gmra.mxu1 %v1324_v4  ;;  %1567 = vmatprep.subr.mxu1 %v3838_v57  ;;  %v3168_v4 = vld [vmem:[%s4084_s4 + $0x38] sm:$0xff]  }
 0x1f4   :  { %1568 = vmatpush1.msra.mxu1 %v3844_v58  ;;  %1603 = vmatprep.mubr.f32.mxu1 %v3247_v61 }
 0x1f5   :  { %1569 = vmatprep.subr.mxu1 %v3851_v59 }
 0x1f6   :  { %1570 = vmatpush1.msra.mxu1 %v3858_v60 }
 0x1f7   :  { %1745 = vmatprep.subr.mxu1 %v3838_v57 }
 0x24f   :  { %v2755_v8 = vpop.f32.mrf.mxu0  ;;  %v2720_v9 = vpop.f32.mrf.mxu1 }
 0x251   :  { %v2756_v10 = vpop.f32.mrf.mxu0  ;;  %v2721_v11 = vpop.f32.mrf.mxu1 }
 0x252   :  { %v2757_v12 = vadd.f32 %v2756_v10, %v2755_v8  ;;  %v2722_v13 = vadd.f32 %v2721_v11, %v2720_v9  ;;  %v3170_v8 = vld [vmem:[%s4084_s4 + $0x30] sm:$0xff]   ;;  %v3171_v9 = vld [vmem:[%s4084_s4 + $0x68] sm:$0xff]   ;;  %v3173_v11 = vld [vmem:[%s4084_s4 + $0x60] sm:$0xff]  }
 0x253   :  { %v3172_v10 = vld [vmem:[%s4084_s4 + $0x28] sm:$0xff]  }
 0x254   :  { %1401 = vrot.lane.b32.xlu1 %v2757_v12, %s3242_s1  ;;  %1397 = vrot.lane.b32.xlu0 %v2722_v13, %s3243_s9  ;;  %v3174_v12 = vld [vmem:[%s4084_s4 + $0x20] sm:$0xff]   ;;  %v3175_v13 = vld [vmem:[%s4084_s4 + $0x58] sm:$0xff]  }
 0x270   :  { %v2790_v14 = vpop.f32.mrf.mxu1  ;;  %v2825_v15 = vpop.f32.mrf.mxu0 }
 0x272   :  { %v2791_v16 = vpop.f32.mrf.mxu1  ;;  %v2826_v17 = vpop.f32.mrf.mxu0 }
 0x273   :  { %v2792_v18 = vadd.f32 %v2791_v16, %v2790_v14  ;;  %v2827_v19 = vadd.f32 %v2826_v17, %v2825_v15  ;;  %v3176_v14 = vld [vmem:[%s4084_s4 + $0x18] sm:$0xff]   ;;  %v3177_v15 = vld [vmem:[%s4084_s4 + $0x50] sm:$0xff]   ;;  %v3179_v17 = vld [vmem:[%s4084_s4 + $0x48] sm:$0xff]  }
 0x274   :  { %v3178_v16 = vld [vmem:[%s4084_s4 + $0x10] sm:$0xff]  }
 0x275   :  { %1405 = vrot.lane.b32.xlu0 %v2792_v18, %s3244_s22  ;;  %1409 = vrot.lane.b32.xlu1 %v2827_v19, %s3240_s2  ;;  %v3180_v18 = vld [vmem:[%s4084_s4 + $0x8] sm:$0xff]   ;;  %v3181_v19 = vld [vmem:[%s4084_s4 + $0x40] sm:$0xff]  }
 0x292   :  { %v2860_v20 = vpop.f32.mrf.mxu1  ;;  %v2895_v21 = vpop.f32.mrf.mxu0 }
 0x294   :  { %v2861_v22 = vpop.f32.mrf.mxu1  ;;  %v2896_v23 = vpop.f32.mrf.mxu0 }
 0x295   :  { %v2862_v24 = vadd.f32 %v2861_v22, %v2860_v20  ;;  %v2897_v25 = vadd.f32 %v2896_v23, %v2895_v21  ;;  %v3182_v20 = vld [vmem:[%s4084_s4] sm:$0xff]   ;;  %v2318_v21 = vld [vmem:[%s4087_s7 + $0x78] sm:$0xff]  ;;  %v2317_v22 = vld [vmem:[%s4087_s7 + $0x70] sm:$0xff] }
 0x296   :  { %v2316_v23 = vld [vmem:[%s4087_s7 + $0x68] sm:$0xff] }
 0x297   :  { %1413 = vrot.lane.b32.xlu0 %v2862_v24, %s3245_s23  ;;  %1417 = vrot.lane.b32.xlu1 %v2897_v25, %s3241_s21  ;;  %v2315_v24 = vld [vmem:[%s4087_s7 + $0x60] sm:$0xff] }
 0x2b3   :  { %v2930_v26 = vpop.f32.mrf.mxu1 }
 0x2b5   :  { %v2931_v27 = vpop.f32.mrf.mxu1 }
 0x2b6   :  { %v2932_v28 = vadd.f32 %v2931_v27, %v2930_v26 }
 0x2b8   :  { %1421 = vrot.lane.b32.xlu0 %v2932_v28, %s3246_s24 }
 0x2c6   :  { %v1398_v29 = vpop.permute.xlu0 %1397  ;;  %v1402_v32 = vpop.permute.xlu1 %1401 }
 0x2c7   :  { %v1425_v31 = vsel %vm1424_vm3, %v2687_v30, %v1398_v29 }
 0x2c8   :  { %v1426_v34 = vsel %vm1030_vm2, %v1425_v31, %v1402_v32 }
 0x2e7   :  { %v1406_v33 = vpop.permute.xlu0 %1405  ;;  %v1410_v36 = vpop.permute.xlu1 %1409 }
 0x2e8   :  { %v1428_v35 = vsel %vm1427_vm4, %v1426_v34, %v1406_v33 }
 0x2e9   :  { %v1429_v39 = vsel %vm948_vm0, %v1428_v35, %v1410_v36 }
 0x309   :  { %v1414_v5 = vpop.permute.xlu0 %1413  ;;  %v1418_v47 = vpop.permute.xlu1 %1417 }
 0x30a   :  { %v1431_v46 = vsel %vm1430_vm5, %v1429_v39, %v1414_v5 }
 0x30b   :  { %v1432_v48 = vsel %vm866_vm1, %v1431_v46, %v1418_v47 }
 0x32a   :  { %v1422_v49 = vpop.permute.xlu0 %1421 }
 0x32b   :  { %v1434_v50 = vsel %vm1433_vm6, %v1432_v48, %v1422_v49 }
 0x32c   :  { %v1435_v51 = vmul.f32 1.442695, %v1434_v50 }
 0x32e   :  { %3183 = vpow2.f32 %v1435_v51 }
 0x33b   :  { %v3184_v52 = vpop.eup %3183 }
 0x33c   :  { %1438 = vrot.lane.b32.xlu1 %v3184_v52, %s3246_s24 }
 0x3ae   :  { %v1439_v53 = vpop.permute.xlu1 %1438 }
 0x3af   :  { %v1441_v54 = vadd.f32 %v3184_v52, %v1439_v53 }
 0x3b1   :  { %1443 = vrot.lane.b32.xlu0 %v1441_v54, %s3241_s21 }
 0x423   :  { %v1444_v55 = vpop.permute.xlu0 %1443 }
 0x424   :  { %v1446_v56 = vadd.f32 %v1444_v55, %v1441_v54 }
 0x426   :  { %1448 = vrot.lane.b32.xlu1 %v1446_v56, %s3240_s2 }
 0x498   :  { %v1449_v62 = vpop.permute.xlu1 %1448 }
 0x499   :  { %v1451_v63 = vadd.f32 %v1449_v62, %v1446_v56 }
 0x49b   :  { %v1452_v2 = vadd.f32 1e-08, %v1451_v63 }
 0x49d   :  { %3185 = vrcp.f32 %v1452_v2 }
 0x4aa   :  { %v3186_v3 = vpop.eup %3185 }
 0x4ab   :  { %v1454_v37 = vmul.f32 %v3186_v3, %v3184_v52 }
 0x4ad   :  { %1625 = vrot.lane.b32.xlu1 %v1454_v37, %s3241_s21  ;;  %1535 = vrot.lane.b32.xlu0 %v1454_v37, %s3246_s24 }
 0x4ae   :  { %2625 = vmatmul.mubr.msk.f32.vlgmr.msra.gmra.mxu0 %vm1424_vm3, %v1454_v37 }
 0x4af   :  { %1658 = vmatpush1.msra.mxu0 %v3844_v58  ;;  %1693 = vmatprep.mubr.f32.mxu0 %v3247_v61 }
 0x4b0   :  { %1659 = vmatprep.subr.mxu0 %v3851_v59 }
 0x4b1   :  { %1801 = vrot.lane.b32.xlu1 %v1454_v37, %s3240_s2  ;;  %1713 = vrot.lane.b32.xlu0 %v1454_v37, %s3245_s23 }
 0x4b2   :  { %1660 = vmatpush1.msra.mxu0 %v3858_v60 }
 0x4b3   :  { %1833 = vmatprep.subr.mxu0 %v3838_v57 }
 0x4b5   :  { %1959 = vrot.lane.b32.xlu1 %v1454_v37, %s3242_s1  ;;  %1880 = vrot.lane.b32.xlu0 %v1454_v37, %s3244_s22 }
 0x4b9   :  { %1612 = vrot.lane.b32.xlu1 %v3664_v0, %s3241_s21  ;;  %2038 = vrot.lane.b32.xlu0 %v1454_v37, %s3243_s9 }
 0x4bd   :  { %1700 = vrot.lane.b32.xlu1 %v3664_v0, %s3240_s2  ;;  %1614 = vrot.lane.b32.xlu0 %v3670_v1, %s3241_s21 }
 0x4c1   :  { %1788 = vrot.lane.b32.xlu1 %v3664_v0, %s3242_s1  ;;  %1702 = vrot.lane.b32.xlu0 %v3670_v1, %s3240_s2 }
 0x4c5   :  { %1790 = vrot.lane.b32.xlu0 %v3670_v1, %s3242_s1 }
 0x51f   :  { %v1626_v38 = vpop.permute.xlu1 %1625  ;;  %v1536_v41 = vpop.permute.xlu0 %1535 }
 0x520   :  { %2626 = vmatmul.mubr.msk.f32.vlgmr.msra.gmra.mxu1 %vm1424_vm3, %v1536_v41  ;;  %2627 = vmatmul.mubr.msk.f32.vlgmr.msra.gmra.mxu0 %vm1424_vm3, %v1626_v38 }
 0x521   :  { %1746 = vmatpush1.msra.mxu1 %v3844_v58  ;;  %1834 = vmatpush1.msra.mxu0 %v3844_v58 }
 0x522   :  { %1747 = vmatprep.subr.mxu1 %v3851_v59  ;;  %1835 = vmatprep.subr.mxu0 %v3851_v59 }
 0x523   :  { %1748 = vmatpush1.msra.mxu1 %v3858_v60  ;;  %v1802_v42 = vpop.permute.xlu1 %1801  ;;  %1781 = vmatprep.mubr.f32.mxu1 %v3247_v61  ;;  %v1714_v43 = vpop.permute.xlu0 %1713 }
 0x524   :  { %1912 = vmatprep.subr.mxu1 %v3838_v57  ;;  %1836 = vmatpush1.msra.mxu0 %v3858_v60 }
 0x525   :  { %1869 = vmatprep.mubr.f32.mxu0 %v3247_v61  ;;  %2628 = vmatmul.mubr.msk.f32.vlgmr.msra.gmra.mxu1 %vm1424_vm3, %v1714_v43 }
 0x526   :  { %2629 = vmatmul.mubr.msk.f32.vlgmr.msra.gmra.mxu0 %vm1424_vm3, %v1802_v42  ;;  %1913 = vmatpush1.msra.mxu1 %v3844_v58 }
 0x527   :  { %1991 = vmatprep.subr.mxu0 %v3838_v57  ;;  %1914 = vmatprep.subr.mxu1 %v3851_v59  ;;  %v1881_v40 = vpop.permute.xlu0 %1880  ;;  %v1960_v44 = vpop.permute.xlu1 %1959 }
 0x528   :  { %1992 = vmatpush1.msra.mxu0 %v3844_v58  ;;  %1915 = vmatpush1.msra.mxu1 %v3858_v60 }
 0x529   :  { %1993 = vmatprep.subr.mxu0 %v3851_v59  ;;  %1948 = vmatprep.mubr.f32.mxu1 %v3247_v61 }
 0x52a   :  { %2070 = vmatprep.subr.mxu1 %v3838_v57  ;;  %1994 = vmatpush1.msra.mxu0 %v3858_v60 }
 0x52b   :  { %2027 = vmatprep.mubr.f32.mxu0 %v3247_v61  ;;  %2630 = vmatmul.mubr.msk.f32.vlgmr.msra.gmra.mxu1 %vm1424_vm3, %v1881_v40  ;;  %v2039_v6 = vpop.permute.xlu0 %2038  ;;  %v1613_v26 = vpop.permute.xlu1 %1612 }
 0x52c   :  { %2631 = vmatmul.mubr.msk.f32.vlgmr.msra.gmra.mxu0 %vm1424_vm3, %v1960_v44  ;;  %2071 = vmatpush1.msra.mxu1 %v3844_v58 }
 0x52d   :  { %2072 = vmatprep.subr.mxu1 %v3851_v59  ;;  %2106 = vmatprep.mubr.f32.mxu1 %v3247_v61 }
 0x52e   :  { %2073 = vmatpush1.msra.mxu1 %v3858_v60  ;;  %2933 = vmatprep.subr.bf16.mxu0 %v3167_v45 }
 0x52f   :  { %2632 = vmatmul.mubr.msk.f32.vlgmr.msra.gmra.mxu1 %vm1424_vm3, %v2039_v6  ;;  %2934 = vmatpush3.bf16.msra.mxu0 %v3168_v4  ;;  %v1615_v25 = vpop.permute.xlu0 %1614  ;;  %v1701_v29 = vpop.permute.xlu1 %1700 }
 0x530   :  { %2935 = vmatprep.subr.bf16.mxu0 %v3169_v7  ;;  %2972 = vmatprep.subr.mxu1 %v3247_v61  ;;  %v1616_v32 = vsel %vm866_vm1, %v1613_v26, %v1615_v25  ;;  %v1620_v46 = vsel %vm866_vm1, %v1615_v25, %v1613_v26  ;;  %v2311_v25 = vld [vmem:[%s4087_s7 + $0x40] sm:$0xff]  ;;  %v2310_v26 = vld [vmem:[%s4087_s7 + $0x38] sm:$0xff] }
 0x531   :  { %2973 = vmatpush3.msra.mxu1 %v2318_v21  ;;  %3004 = vmatprep.mubr.msk.f32.mxu1 %vm3248_vm7, %v3247_v61 }
 0x532   :  { %2974 = vmatprep.subr.mxu1 %v3247_v61 }
 0x533   :  { %2936 = vmatpush3.bf16.msra.mxu0 %v3170_v8  ;;  %2975 = vmatpush3.msra.mxu1 %v2317_v22  ;;  %v1703_v28 = vpop.permute.xlu0 %1702  ;;  %v1789_v52 = vpop.permute.xlu1 %1788  ;;  %v2314_v22 = vld [vmem:[%s4087_s7 + $0x58] sm:$0xff] }
 0x534   :  { %2937 = vmatprep.subr.bf16.mxu0 %v3171_v9  ;;  %2976 = vmatprep.subr.mxu1 %v3247_v61  ;;  %v1704_v5 = vsel %vm948_vm0, %v1701_v29, %v1703_v28  ;;  %v1708_v53 = vsel %vm948_vm0, %v1703_v28, %v1701_v29  ;;  %v2308_v28 = vld [vmem:[%s4087_s7 + $0x28] sm:$0xff]  ;;  %v2307_v29 = vld [vmem:[%s4087_s7 + $0x20] sm:$0xff] }
 0x535   :  { %2977 = vmatpush3.msra.mxu1 %v2316_v23  ;;  %v2313_v23 = vld [vmem:[%s4087_s7 + $0x50] sm:$0xff] }
 0x536   :  { %2978 = vmatprep.subr.mxu1 %v3247_v61 }
 0x537   :  { %2938 = vmatpush3.bf16.msra.mxu0 %v3172_v10  ;;  %2979 = vmatpush3.msra.mxu1 %v2315_v24  ;;  %v1791_v34 = vpop.permute.xlu0 %1790  ;;  %v2312_v24 = vld [vmem:[%s4087_s7 + $0x48] sm:$0xff] }
 0x538   :  { %2939 = vmatprep.subr.bf16.mxu0 %v3173_v11  ;;  %2980 = vmatprep.subr.mxu1 %v3247_v61  ;;  %v1792_v58 = vsel %vm1030_vm2, %v1789_v52, %v1791_v34  ;;  %v1796_v2 = vsel %vm1030_vm2, %v1791_v34, %v1789_v52  ;;  %v2651_v34 = vld [vmem:[#allocation2] ss:$0 sm:$0xff] }
 0x539   :  { %2981 = vmatpush3.msra.mxu1 %v2314_v22 }
 0x53a   :  { %2982 = vmatprep.subr.mxu1 %v3247_v61 }
 0x53b   :  { %2940 = vmatpush3.bf16.msra.mxu0 %v3174_v12  ;;  %2983 = vmatpush3.msra.mxu1 %v2313_v23 }
 0x53c   :  { %2941 = vmatprep.subr.bf16.mxu0 %v3175_v13  ;;  %2984 = vmatprep.subr.mxu1 %v3247_v61 }
 0x53d   :  { %2985 = vmatpush3.msra.mxu1 %v2312_v24 }
 0x53e   :  { %2986 = vmatprep.subr.mxu1 %v3247_v61 }
 0x53f   :  { %2942 = vmatpush3.bf16.msra.mxu0 %v3176_v14  ;;  %2987 = vmatpush3.msra.mxu1 %v2311_v25 }
 0x540   :  { %2943 = vmatprep.subr.bf16.mxu0 %v3177_v15  ;;  %2988 = vmatprep.subr.mxu1 %v3247_v61 }
 0x541   :  { %2989 = vmatpush3.msra.mxu1 %v2310_v26 }
 0x542   :  { %2990 = vmatprep.subr.mxu1 %v3247_v61 }
 0x543   :  { %2944 = vmatpush3.bf16.msra.mxu0 %v3178_v16 }
 0x544   :  { %2945 = vmatprep.subr.bf16.mxu0 %v3179_v17 }
 0x547   :  { %2946 = vmatpush3.bf16.msra.mxu0 %v3180_v18 }
 0x548   :  { %2947 = vmatprep.subr.bf16.mxu0 %v3181_v19 }
 0x54b   :  { %2948 = vmatpush3.bf16.msra.mxu0 %v3182_v20 }
 0x56e   :  { %v1528_v27 = vpop.f32.mrf.mxu0 }
 0x56f   :  { %v1533_v35 = vmul.f32 %v1528_v27, %v3664_v0  ;;  %v2309_v27 = vld [vmem:[%s4087_s7 + $0x30] sm:$0xff] }
 0x570   :  { %v1530_v30 = vpop.f32.mrf.mxu0  ;;  %2991 = vmatpush3.msra.mxu1 %v2309_v27 }
 0x571   :  { %v1534_v48 = vmul.f32 %v1530_v30, %v3670_v1  ;;  %2992 = vmatprep.subr.mxu1 %v3247_v61  ;;  %v2306_v30 = vld [vmem:[%s4087_s7 + $0x18] sm:$0xff] }
 0x572   :  { %2993 = vmatpush3.msra.mxu1 %v2308_v28 }
 0x573   :  { %2994 = vmatprep.subr.mxu1 %v3247_v61 }
 0x574   :  { %2995 = vmatpush3.msra.mxu1 %v2307_v29 }
 0x575   :  { %2996 = vmatprep.subr.mxu1 %v3247_v61 }
 0x576   :  { %2997 = vmatpush3.msra.mxu1 %v2306_v30 }
 0x577   :  { %2998 = vmatprep.subr.mxu1 %v3247_v61 }
 0x5e0   :  { %v1605_v31 = vpop.f32.mrf.mxu1  ;;  %v1695_v33 = vpop.f32.mrf.mxu0 }
 0x5e1   :  { %v1621_v36 = vmul.f32 %v1616_v32, %v1605_v31  ;;  %v1709_v50 = vmul.f32 %v1704_v5, %v1695_v33  ;;  %v2305_v31 = vld [vmem:[%s4087_s7 + $0x10] sm:$0xff]  ;;  %v2303_v33 = vld [vmem:[%s4087_s7] sm:$0xff] }
 0x5e2   :  { %v1607_v39 = vpop.f32.mrf.mxu1  ;;  %v1697_v47 = vpop.f32.mrf.mxu0  ;;  %2999 = vmatpush3.msra.mxu1 %v2305_v31 }
 0x5e3   :  { %v1623_v49 = vadd.f32 %v1621_v36, %v1533_v35  ;;  %v1622_v51 = vmul.f32 %v1620_v46, %v1607_v39  ;;  %v1710_v56 = vmul.f32 %v1708_v53, %v1697_v47  ;;  %3000 = vmatprep.subr.mxu1 %v3247_v61  ;;  %v3249_v35 = vmov 0  }
 0x5e4   :  { %3021 = vset.pattern.permute.xlu1 %v3249_v35  ;;  %3022 = vset.pattern.permute.xlu0 %v3249_v35 }
 0x5e5   :  { %v1711_v54 = vadd.f32 %v1709_v50, %v1623_v49  ;;  %v1624_v55 = vadd.f32 %v1622_v51, %v1534_v48  ;;  %v1783_v57 = vpop.f32.mrf.mxu1  ;;  %2326 = vperm.xlu1 %3021, %v2651_v34   ;;  %v2650_v50 = vld [vmem:[%s4086_s6] ss:$0 sm:$0xff] }
 0x5e6   :  { %v1797_v59 = vmul.f32 %v1792_v58, %v1783_v57  ;;  %v1871_v60 = vpop.f32.mrf.mxu0 }
 0x5e7   :  { %v1712_v62 = vadd.f32 %v1710_v56, %v1624_v55  ;;  %v1785_v63 = vpop.f32.mrf.mxu1  ;;  %v1876_v37 = vmul.f32 %v1871_v60, %v3670_v1  ;;  %v2409_v60 = vld [vmem:[%s4088_s8 + $0x8] sm:$0xff] }
 0x5e8   :  { %v1799_v3 = vadd.f32 %v1797_v59, %v1711_v54  ;;  %v1798_v38 = vmul.f32 %v1796_v2, %v1785_v63  ;;  %v1873_v41 = vpop.f32.mrf.mxu0 }
 0x5e9   :  { %v1877_v40 = vmul.f32 %v1873_v41, %v3664_v0 }
 0x5ea   :  { %v1878_v42 = vadd.f32 %v1876_v37, %v1799_v3  ;;  %v1800_v43 = vadd.f32 %v1798_v38, %v1712_v62  ;;  %v2408_v62 = vld [vmem:[%s4088_s8] sm:$0xff]  ;;  %s3250_s8 = smov [#allocation6]  }
 0x5eb   :  { %v1950_v44 = vpop.f32.mrf.mxu1 }
 0x5ec   :  { %v1879_v45 = vadd.f32 %v1877_v40, %v1800_v43  ;;  %v1955_v4 = vmul.f32 %v1950_v44, %v1620_v46  ;;  %v2029_v6 = vpop.f32.mrf.mxu0 }
 0x5ed   :  { %v1952_v7 = vpop.f32.mrf.mxu1  ;;  %v2034_v9 = vmul.f32 %v2029_v6, %v1708_v53 }
 0x5ee   :  { %v1957_v8 = vadd.f32 %v1955_v4, %v1878_v42  ;;  %v1956_v10 = vmul.f32 %v1952_v7, %v1616_v32  ;;  %v2031_v11 = vpop.f32.mrf.mxu0  ;;  %v2304_v32 = vld [vmem:[%s4087_s7 + $0x8] sm:$0xff] }
 0x5ef   :  { %v2108_v12 = vpop.f32.mrf.mxu1  ;;  %v2035_v15 = vmul.f32 %v2031_v11, %v1704_v5  ;;  %3001 = vmatpush3.msra.mxu1 %v2304_v32  ;;  %v2633_v5 = vld [vmem:[%s4085_s5] ss:$0 sm:$0xff] }
 0x5f0   :  { %v2036_v13 = vadd.f32 %v2034_v9, %v1957_v8  ;;  %v1958_v14 = vadd.f32 %v1956_v10, %v1879_v45  ;;  %v2113_v1 = vmul.f32 %v2108_v12, %v1796_v2  ;;  %3002 = vmatprep.subr.mxu1 %v3247_v61 }
 0x5f1   :  { %v2110_v16 = vpop.f32.mrf.mxu1  ;;  %3003 = vmatpush3.msra.mxu1 %v2303_v33 }
 0x5f2   :  { %v2037_v17 = vadd.f32 %v2035_v15, %v1958_v14  ;;  %v2114_v18 = vmul.f32 %v2110_v16, %v1792_v58  ;;  %v3997_v19 = vadd.f32 %v2113_v1, %v2036_v13  ;;  %2443 = vmatprep.subr.mxu1 %v2409_v60 }
 0x5f4   :  { %v3999_v0 = vadd.f32 %v2114_v18, %v2037_v17  ;;  %v2117_v21 = vpack.c.bf16 %v3997_v19, %v3997_v19 }
 0x5f6   :  { %v2118_v20 = vpack.c.bf16 %v3999_v0, %v3999_v0 }
 0x5f8   :  { %2286 = vmatprep.mubr.bf16.mxu0 %v2118_v20 }
 0x5f9   :  { %2287 = vmatmul.mubr.bf16.vlgmr.msra.gmra.mxu0 %v2117_v21 }
 0x660   :  { %v2327_v53 = vpop.permute.xlu1 %2326 }
 0x6b9   :  { %v2949_v36 = vpop.f32.mrf.mxu0 }
 0x6bb   :  { %v2950_v39 = vpop.f32.mrf.mxu0 }
 0x6bc   :  { %v2951_v46 = vadd.f32 %v2950_v39, %v2949_v36 }
 0x6bd   :  { %v2952_v47 = vpop.f32.mrf.mxu0 }
 0x6be   :  { %v2289_v48 = vadd.f32 %v2951_v46, %v2633_v5 }
 0x6bf   :  { %v2953_v49 = vpop.f32.mrf.mxu0 }
 0x6c0   :  { %3187 = vtanh.f32 %v2289_v48 }
 0x6cd   :  { %v3188_v51 = vpop.eup %3187 }
 0x6ce   :  { %v2302_v52 = vmul.f32 %v3188_v51, %v2650_v50 }
 0x6d0   :  { %3005 = vmatmul.mubr.f32.vlgmr.msra.gmra.mxu1 %v2302_v52 }
 0x6d1   :  { %2477 = vmatprep.mubr.f32.mxu1 %v3247_v61  ;;  %2444 = vmatpush1.msra.mxu1 %v2408_v62 }
 0x790   :  { %v2395_v54 = vpop.f32.mrf.mxu1 }
 0x791   :  { %v2396_v55 = vadd.f32 %v2395_v54, %v2327_v53 }
 0x792   :  { %v3006_v56 = vpop.f32.mrf.mxu1 }
 0x793   :  { %v2399_v57 = vmul.f32 1.442695, %v2396_v55 }
 0x795   :  { %3189 = vpow2.f32 %v2399_v57 }
 0x7a2   :  { %v3190_v58 = vpop.eup %3189 }
 0x7a3   :  { %v2402_v59 = vsel %vm2401_vm8, %v3190_v58, 0.0 }
 0x7a4   :  { %2403 = vadd.xlane.f32.xlu0 %v2402_v59 }
 0x82d   :  { %v2404_v61 = vpop.xlane.xlu0 %2403 }
 0x82e   :  { %v2405_v63 = vadd.f32 1e-08, %v2404_v61 }
 0x830   :  { %3191 = vrcp.f32 %v2405_v63 }
 0x83d   :  { %v3192_v2 = vpop.eup %3191 }
 0x83e   :  { %v2407_v3 = vmul.f32 %v3192_v2, %v3190_v58 }
 0x840   :  { %2652 = vmatmul.mubr.msk.f32.vlgmr.msra.gmra.mxu1 %vm2401_vm8, %v2407_v3 }
 0x900   :  { %v2479_v37 = vpop.f32.mrf.mxu1 }
 0x901   :  { %v2484_v38 = vmul.f32 %v2479_v37, %v3997_v19 }
 0x902   :  { %v2481_v41 = vpop.f32.mrf.mxu1 }
 0x903   :  { %2488 = vrot.lane.b32.xlu1 %v2484_v38, %s3241_s21  ;;  %v2485_v42 = vmul.f32 %v2481_v41, %v3999_v0 }
 0x907   :  { %2490 = vrot.lane.b32.xlu1 %v2485_v42, %s3241_s21  ;;  %s2520_s21 = sshll.u32 %s3250_s8, 4  ;;  %s2521_s21 = int_to_ptr.vmem [resolvable:$true] %s2520_s21 }
 0x908   :  { %s3213_s30 = scalar_lea.vmem %s2521_s21, 128  ;;  %p3218_p6 = scmp.lt.s32.totalorder %s2521_s21, %s2521_s21 }
 0x909   :  { %p3214_p5 = scmp.ne.s32.totalorder %s2521_s21, %s3213_s30  ;;  %p3219_p7 = scmp.lt.s32.totalorder %s3213_s30, %s3213_s30 }
 0x90b   :  { %p3220_p8 = por %p3219_p7, %p3218_p6 }
 0x90d   :  { %p3221_p9 = pnand %p3220_p8, %p3214_p5 }
 0x975   :  { %v2489_v43 = vpop.permute.xlu1 %2488 }
 0x979   :  { %v2491_v40 = vpop.permute.xlu1 %2490 }
 0x97a   :  { %v2492_v44 = vsel %vm866_vm1, %v2489_v43, %v2491_v40  ;;  %v2496_v4 = vsel %vm866_vm1, %v2491_v40, %v2489_v43 }
 0x97b   :  { %v2497_v45 = vadd.f32 %v2492_v44, %v2484_v38  ;;  %v2498_v6 = vadd.f32 %v2496_v4, %v2485_v42 }
 0x97d   :  { %2501 = vrot.lane.b32.xlu1 %v2497_v45, %s3240_s2 }
 0x981   :  { %2503 = vrot.lane.b32.xlu1 %v2498_v6, %s3240_s2 }
 0x9ef   :  { %v2502_v7 = vpop.permute.xlu1 %2501 }
 0x9f3   :  { %v2504_v8 = vpop.permute.xlu1 %2503 }
 0x9f4   :  { %v2505_v9 = vsel %vm948_vm0, %v2502_v7, %v2504_v8  ;;  %v2509_v10 = vsel %vm948_vm0, %v2504_v8, %v2502_v7 }
 0x9f5   :  { %v2510_v11 = vadd.f32 %v2505_v9, %v2497_v45  ;;  %v2511_v12 = vadd.f32 %v2509_v10, %v2498_v6 }
 0x9f7   :  { %v2512_v13 = vadd.f32 %v2511_v12, %v2510_v11 }
 0x9f9   :  { %2513 = vst.msk [vmem:[#allocation6] sm:$0xff] %vm1030_vm2, %v2512_v13 }
 0x9fa   :  { %3224 = shalt.err (!%p3221_p9)
}
 0x9fb   :  { %2523 = dma.vmem_to_hbm [thread:$0]  %s2521_s21, 128, %s4090_s10, [#allocation5]  }
 0x9fc   :  { %3235 = dma.done.wait [#allocation5], 128  }
 0x9fd   :  { %3236 = vsyncadd [#allocation5], 4294967168 }
 0x9fe   :  { %2527 = vsyncpa [#allocation4], 1 }
 0x9ff   :  { %2528 = vsyncpa [#allocation5], 1 }

</bundles_post_ra>
